<compile_context>
chip_gen: v7x
topology: tpu7x:2x2x1
jax: 0.10.0
libtpu: 0.0.40
codegen_flags: <defaults>
</compile_context>

<pallas_src>
import jax
import jax.numpy as jnp
from jax.experimental import pallas as pl
from jax.experimental.pallas import tpu as pltpu

LN_EPS = 1e-5


def node_processor_kernel(j_ref, node_ref, edge_ref,
                          w1a_ref, w1b_ref, b1_ref,
                          w2_ref, b2_ref, gamma_ref, beta_ref,
                          out_ref, scat_acc):
    i = pl.program_id(0)            # node-tile index ("parallel")
    k = pl.program_id(1)            # edge-tile index (reduction, "arbitrary")
    nk = pl.num_programs(1)
    tn = scat_acc.shape[0]
    te = j_ref.shape[1]

    @pl.when(k == 0)
    def _init():
        scat_acc[...] = jnp.zeros_like(scat_acc)

    # --- partial scatter-add for this (node-tile, edge-tile) block (MXU) ---
    # one-hot(j) is exact in bf16; padded edges carry j = -1 and never match.
    # Subtract the tile offset from the (1, te) row (cheap) rather than adding
    # it to the (tn, te) iota (full-tile VPU op).
    j_local = j_ref[...] - i * tn                                   # (1, te) int32
    row = jax.lax.broadcasted_iota(jnp.int32, (tn, te), 0)          # (tn, te)
    onehot = (row == j_local).astype(jnp.bfloat16)                  # (tn, te)
    scat_acc[...] += jnp.dot(onehot, edge_ref[...],                 # bf16 in, f32 acc
                             preferred_element_type=jnp.float32)

    # --- finalize on the last edge tile: MLP(SiLU) + LayerNorm + residual ---
    @pl.when(k == nk - 1)
    def _finalize():
        node_f32 = node_ref[...].astype(jnp.float32)                # single load
        # concat([node, scat]) @ W1 == node @ W1a + scat @ W1b
        h = (jnp.dot(node_f32.astype(jnp.bfloat16), w1a_ref[...],
                     preferred_element_type=jnp.float32)
             + jnp.dot(scat_acc[...].astype(jnp.bfloat16), w1b_ref[...],
                       preferred_element_type=jnp.float32)
             + b1_ref[...])                                         # (tn, H) f32
        h = h * jax.nn.sigmoid(h)                                   # SiLU (f32, EUP sigmoid)

        y = jnp.dot(h.astype(jnp.bfloat16), w2_ref[...],
                    preferred_element_type=jnp.float32) + b2_ref[...]

        mean = jnp.mean(y, axis=-1, keepdims=True)                  # XLU reductions
        var = jnp.mean((y - mean) ** 2, axis=-1, keepdims=True)
        y = (y - mean) * jax.lax.rsqrt(var + LN_EPS)                # EUP rsqrt
        y = y * gamma_ref[...] + beta_ref[...]

        out_ref[...] = (y + node_f32).astype(out_ref.dtype)


def node_processor(node_attr, edge_index_j, edge_attr, params,
                   *, tile_n=128, tile_e=512):
    """node_attr: (N, F_node) f32, edge_index_j: (E,) int32, edge_attr: (E, F_edge) f32."""
    N, Fn = node_attr.shape
    E, Fe = edge_attr.shape
    w1a, w1b, b1, w2, b2, gamma, beta = params
    H = w1a.shape[1]

    tn = min(tile_n, -(-N // 8) * 8)
    te = min(tile_e, -(-E // 8) * 8)
    Np = -(-N // tn) * tn
    Ep = -(-E // te) * te

    node_p = node_attr if Np == N else jnp.pad(node_attr, ((0, Np - N), (0, 0)))
    j_p = edge_index_j.astype(jnp.int32)
    edge_p = edge_attr
    if Ep != E:
        j_p = jnp.pad(j_p, (0, Ep - E), constant_values=-1)   # -1 -> dropped by one-hot
        edge_p = jnp.pad(edge_attr, ((0, Ep - E), (0, 0)))
    j2d = j_p.reshape(1, Ep)

    # bf16 matmul inputs (f32 accumulation inside the kernel).
    edge_bf = edge_p.astype(jnp.bfloat16)
    w1a_bf = w1a.astype(jnp.bfloat16)
    w1b_bf = w1b.astype(jnp.bfloat16)
    w2_bf = w2.astype(jnp.bfloat16)

    grid = (Np // tn, Ep // te)
    const = lambda i, k: (0, 0)                 # weights stay VMEM-resident

    in_specs = [
        pl.BlockSpec((1, te), lambda i, k: (0, k)),     # j indices (streamed over E)
        pl.BlockSpec((tn, Fn), lambda i, k: (i, 0)),    # node tile (resident over k)
        pl.BlockSpec((te, Fe), lambda i, k: (k, 0)),    # edge tile (streamed, dbl-buffered)
        pl.BlockSpec((Fn, H), const),                   # W1a
        pl.BlockSpec((Fe, H), const),                   # W1b
        pl.BlockSpec((1, H), const),                    # b1
        pl.BlockSpec((H, Fn), const),                   # W2
        pl.BlockSpec((1, Fn), const),                   # b2
        pl.BlockSpec((1, Fn), const),                   # gamma
        pl.BlockSpec((1, Fn), const),                   # beta
    ]
    out_specs = pl.BlockSpec((tn, Fn), lambda i, k: (i, 0))

    flops = 2 * Np * Ep * Fe + 2 * Np * (Fn + Fe) * H + 2 * Np * H * Fn
    bytes_accessed = (grid[0] * Ep * Fe * 2 + grid[0] * Ep * 4
                      + Np * Fn * 4 * 2
                      + (Fn * H + Fe * H + H * Fn) * 2 + (H + 3 * Fn) * 4)
    cost = pl.CostEstimate(flops=flops,
                           transcendentals=Np * H + Np,
                           bytes_accessed=bytes_accessed)

    out = pl.pallas_call(
        node_processor_kernel,
        out_shape=jax.ShapeDtypeStruct((Np, Fn), node_attr.dtype),
        grid_spec=pltpu.PrefetchScalarGridSpec(
            num_scalar_prefetch=0,
            grid=grid,
            in_specs=in_specs,
            out_specs=out_specs,
            scratch_shapes=[pltpu.VMEM((tn, Fe), jnp.float32)],    # scat accumulator
        ),
        compiler_params=pltpu.CompilerParams(
            dimension_semantics=("parallel", "arbitrary"),
            vmem_limit_bytes=32 * 1024 * 1024,    # fits v5e/v6e/v7x scoped budgets
        ),
        cost_estimate=cost,
    )(j2d, node_p, edge_bf,
      w1a_bf, w1b_bf, b1.reshape(1, H),
      w2_bf, b2.reshape(1, Fn), gamma.reshape(1, Fn), beta.reshape(1, Fn))

    return out[:N] if Np != N else out


def init_params(key, f_node, f_edge, hidden):
    """Deterministic PyTorch-style Linear init; LayerNorm weight=1, bias=0."""
    f_in = f_node + f_edge
    k1, k2, k3, k4 = jax.random.split(key, 4)
    lim1 = 1.0 / jnp.sqrt(f_in)
    w1 = jax.random.uniform(k1, (f_in, hidden), jnp.float32, -lim1, lim1)
    b1 = jax.random.uniform(k2, (hidden,), jnp.float32, -lim1, lim1)
    lim2 = 1.0 / jnp.sqrt(hidden)
    w2 = jax.random.uniform(k3, (hidden, f_node), jnp.float32, -lim2, lim2)
    b2 = jax.random.uniform(k4, (f_node,), jnp.float32, -lim2, lim2)
    gamma = jnp.ones((f_node,), jnp.float32)
    beta = jnp.zeros((f_node,), jnp.float32)
    w1a, w1b = w1[:f_node], w1[f_node:]
    return (w1a, w1b, b1, w2, b2, gamma, beta)


def reference(node_attr, edge_index_j, edge_attr, params):
    """Plain-JAX f32 reference matching the PyTorch forward."""
    w1a, w1b, b1, w2, b2, gamma, beta = params
    N = node_attr.shape[0]
    scat = jnp.zeros((N, edge_attr.shape[1]), jnp.float32).at[edge_index_j].add(edge_attr)
    x = jnp.concatenate([node_attr, scat], axis=-1)
    w1 = jnp.concatenate([w1a, w1b], axis=0)
    h = x @ w1 + b1
    h = h * jax.nn.sigmoid(h)
    y = h @ w2 + b2
    mean = jnp.mean(y, -1, keepdims=True)
    var = jnp.mean((y - mean) ** 2, -1, keepdims=True)
    y = (y - mean) / jnp.sqrt(var + LN_EPS) * gamma + beta
    return y + node_attr


if __name__ == "__main__":
    key = jax.random.PRNGKey(0)
    k_node, k_edge, k_idx, k_par = jax.random.split(key, 4)

    # Small but lane-aligned shapes: hidden_size_list = [F_NODE + F_EDGE, H, F_NODE]
    N, E = 256, 1024
    F_NODE, F_EDGE, H = 128, 128, 128

    node_attr = jax.random.normal(k_node, (N, F_NODE), jnp.float32)
    edge_attr = jax.random.normal(k_edge, (E, F_EDGE), jnp.float32)
    edge_index_j = jax.random.randint(k_idx, (E,), 0, N, jnp.int32)

    params = init_params(k_par, F_NODE, F_EDGE, H)

    out = node_processor(node_attr, edge_index_j, edge_attr, params,
                         tile_n=128, tile_e=512)
    out = jax.block_until_ready(out)

    ref = reference(node_attr, edge_index_j, edge_attr, params)
    assert out.shape == (N, F_NODE)
    # bf16 matmul inputs (f32 accumulate) vs pure-f32 reference -> loosened tolerance.
    max_diff = float(jnp.max(jnp.abs(out - ref)))
    assert jnp.allclose(out, ref, atol=5e-2, rtol=2e-2), \
        f"mismatch vs reference, max abs diff = {max_diff}"

    print("KERNEL_OK")
</pallas_src>

<mosaic_0001>
module attributes {stable_mosaic.version = 11 : i64} {
  func.func @node_processor_kernel(%arg0: i32, %arg1: i32, %arg2: memref<1x512xi32, #tpu.memory_space<vmem>>, %arg3: memref<128x128xf32, #tpu.memory_space<vmem>>, %arg4: memref<512x128xbf16, #tpu.memory_space<vmem>>, %arg5: memref<128x128xbf16, #tpu.memory_space<vmem>>, %arg6: memref<128x128xbf16, #tpu.memory_space<vmem>>, %arg7: memref<1x128xf32, #tpu.memory_space<vmem>>, %arg8: memref<128x128xbf16, #tpu.memory_space<vmem>>, %arg9: memref<1x128xf32, #tpu.memory_space<vmem>>, %arg10: memref<1x128xf32, #tpu.memory_space<vmem>>, %arg11: memref<1x128xf32, #tpu.memory_space<vmem>>, %arg12: memref<128x128xf32, #tpu.memory_space<vmem>>, %arg13: memref<128x128xf32, #tpu.memory_space<vmem>>) attributes {dimension_semantics = [#tpu.dimension_semantics<parallel>, #tpu.dimension_semantics<arbitrary>], iteration_bounds = array<i64: 2, 2>, scalar_prefetch = 0 : i64, scratch_operands = 1 : i64, tpu.core_type = #tpu.core_type<tc>, window_params = [{transform_indices = @transform_0, window_bounds = array<i64: 1, 512>}, {transform_indices = @transform_1, window_bounds = array<i64: 128, 128>}, {transform_indices = @transform_2, window_bounds = array<i64: 512, 128>}, {pipeline_mode = #tpu.pipeline_mode<synchronous>, transform_indices = @transform_3, window_bounds = array<i64: 128, 128>}, {pipeline_mode = #tpu.pipeline_mode<synchronous>, transform_indices = @transform_4, window_bounds = array<i64: 128, 128>}, {pipeline_mode = #tpu.pipeline_mode<synchronous>, transform_indices = @transform_5, window_bounds = array<i64: 1, 128>}, {pipeline_mode = #tpu.pipeline_mode<synchronous>, transform_indices = @transform_6, window_bounds = array<i64: 128, 128>}, {pipeline_mode = #tpu.pipeline_mode<synchronous>, transform_indices = @transform_7, window_bounds = array<i64: 1, 128>}, {pipeline_mode = #tpu.pipeline_mode<synchronous>, transform_indices = @transform_8, window_bounds = array<i64: 1, 128>}, {pipeline_mode = #tpu.pipeline_mode<synchronous>, transform_indices = @transform_9, window_bounds = array<i64: 1, 128>}, {transform_indices = @transform_10, window_bounds = array<i64: 128, 128>}]} {
    %c0_i32 = arith.constant 0 : i32
    %0 = arith.cmpi eq, %arg1, %c0_i32 : i32
    %1 = arith.extui %0 : i1 to i32
    %c0_i32_0 = arith.constant 0 : i32
    %2 = arith.cmpi ne, %1, %c0_i32_0 : i32
    scf.if %2 {
      %cst_9 = arith.constant 0.000000e+00 : f32
      %21 = vector.broadcast %cst_9 : f32 to vector<128x128xf32>
      %c0_10 = arith.constant 0 : index
      %c0_11 = arith.constant 0 : index
      %22 = vector.load %arg13[%c0_10, %c0_11] : memref<128x128xf32, #tpu.memory_space<vmem>>, vector<128x128xf32>
      tpu.vector_store %arg13[%c0_10, %c0_11], %21 {strides = array<i32>} : memref<128x128xf32, #tpu.memory_space<vmem>>, vector<128x128xf32>,
    } else {
    }
    %c0 = arith.constant 0 : index
    %c0_1 = arith.constant 0 : index
    %3 = vector.load %arg2[%c0, %c0_1] : memref<1x512xi32, #tpu.memory_space<vmem>>, vector<1x512xi32>
    %c128_i32 = arith.constant 128 : i32
    %4 = arith.muli %arg0, %c128_i32 : i32
    %5 = vector.broadcast %4 : i32 to vector<1x512xi32>
    %6 = arith.subi %3, %5 : vector<1x512xi32>
    %7 = tpu.iota {dimensions = array<i32: 0>} : vector<128x512xi32>
    %8 = vector.broadcast %6 : vector<1x512xi32> to vector<128x512xi32>
    %9 = arith.cmpi eq, %7, %8 : vector<128x512xi32>
    %10 = arith.extui %9 : vector<128x512xi1> to vector<128x512xi32>
    %11 = arith.sitofp %10 : vector<128x512xi32> to vector<128x512xf32>
    %12 = arith.truncf %11 : vector<128x512xf32> to vector<128x512xbf16>
    %c0_2 = arith.constant 0 : index
    %c0_3 = arith.constant 0 : index
    %13 = vector.load %arg13[%c0_2, %c0_3] : memref<128x128xf32, #tpu.memory_space<vmem>>, vector<128x128xf32>
    %c0_4 = arith.constant 0 : index
    %c0_5 = arith.constant 0 : index
    %14 = vector.load %arg4[%c0_4, %c0_5] : memref<512x128xbf16, #tpu.memory_space<vmem>>, vector<512x128xbf16>
    %cst = arith.constant dense<0.000000e+00> : vector<128x128xf32>
    %15 = tpu.matmul %12, %14, %cst {dimension_numbers = #tpu.dot_dimension_numbers<[1], [0], [0], [1], [0, 0, 1, 1], [], []>} : vector<128x512xbf16>, vector<512x128xbf16>, vector<128x128xf32> -> vector<128x128xf32>
    %16 = arith.addf %13, %15 : vector<128x128xf32>
    %c0_6 = arith.constant 0 : index
    %c0_7 = arith.constant 0 : index
    %17 = vector.load %arg13[%c0_6, %c0_7] : memref<128x128xf32, #tpu.memory_space<vmem>>, vector<128x128xf32>
    tpu.vector_store %arg13[%c0_6, %c0_7], %16 {strides = array<i32>} : memref<128x128xf32, #tpu.memory_space<vmem>>, vector<128x128xf32>,
    %c1_i32 = arith.constant 1 : i32
    %18 = arith.cmpi eq, %arg1, %c1_i32 : i32
    %19 = arith.extui %18 : i1 to i32
    %c0_i32_8 = arith.constant 0 : i32
    %20 = arith.cmpi ne, %19, %c0_i32_8 : i32
    scf.if %20 {
      %c0_9 = arith.constant 0 : index
      %c0_10 = arith.constant 0 : index
      %21 = vector.load %arg3[%c0_9, %c0_10] : memref<128x128xf32, #tpu.memory_space<vmem>>, vector<128x128xf32>
      %22 = arith.truncf %21 : vector<128x128xf32> to vector<128x128xbf16>
      %c0_11 = arith.constant 0 : index
      %c0_12 = arith.constant 0 : index
      %23 = vector.load %arg5[%c0_11, %c0_12] : memref<128x128xbf16, #tpu.memory_space<vmem>>, vector<128x128xbf16>
      %cst_13 = arith.constant dense<0.000000e+00> : vector<128x128xf32>
      %24 = tpu.matmul %22, %23, %cst_13 {dimension_numbers = #tpu.dot_dimension_numbers<[1], [0], [0], [1], [0, 0, 1, 1], [], []>} : vector<128x128xbf16>, vector<128x128xbf16>, vector<128x128xf32> -> vector<128x128xf32>
      %c0_14 = arith.constant 0 : index
      %c0_15 = arith.constant 0 : index
      %25 = vector.load %arg13[%c0_14, %c0_15] : memref<128x128xf32, #tpu.memory_space<vmem>>, vector<128x128xf32>
      %26 = arith.truncf %25 : vector<128x128xf32> to vector<128x128xbf16>
      %c0_16 = arith.constant 0 : index
      %c0_17 = arith.constant 0 : index
      %27 = vector.load %arg6[%c0_16, %c0_17] : memref<128x128xbf16, #tpu.memory_space<vmem>>, vector<128x128xbf16>
      %cst_18 = arith.constant dense<0.000000e+00> : vector<128x128xf32>
      %28 = tpu.matmul %26, %27, %cst_18 {dimension_numbers = #tpu.dot_dimension_numbers<[1], [0], [0], [1], [0, 0, 1, 1], [], []>} : vector<128x128xbf16>, vector<128x128xbf16>, vector<128x128xf32> -> vector<128x128xf32>
      %29 = arith.addf %24, %28 : vector<128x128xf32>
      %c0_19 = arith.constant 0 : index
      %c0_20 = arith.constant 0 : index
      %30 = vector.load %arg7[%c0_19, %c0_20] : memref<1x128xf32, #tpu.memory_space<vmem>>, vector<1x128xf32>
      %31 = vector.broadcast %30 : vector<1x128xf32> to vector<128x128xf32>
      %32 = arith.addf %29, %31 : vector<128x128xf32>
      %33 = arith.negf %32 : vector<128x128xf32>
      %34 = math.exp %33 : vector<128x128xf32>
      %cst_21 = arith.constant 1.000000e+00 : f32
      %35 = vector.broadcast %cst_21 : f32 to vector<128x128xf32>
      %36 = arith.addf %35, %34 : vector<128x128xf32>
      %37 = arith.divf %35, %36 : vector<128x128xf32>
      %38 = arith.mulf %32, %37 : vector<128x128xf32>
      %39 = arith.truncf %38 : vector<128x128xf32> to vector<128x128xbf16>
      %c0_22 = arith.constant 0 : index
      %c0_23 = arith.constant 0 : index
      %40 = vector.load %arg8[%c0_22, %c0_23] : memref<128x128xbf16, #tpu.memory_space<vmem>>, vector<128x128xbf16>
      %cst_24 = arith.constant dense<0.000000e+00> : vector<128x128xf32>
      %41 = tpu.matmul %39, %40, %cst_24 {dimension_numbers = #tpu.dot_dimension_numbers<[1], [0], [0], [1], [0, 0, 1, 1], [], []>} : vector<128x128xbf16>, vector<128x128xbf16>, vector<128x128xf32> -> vector<128x128xf32>
      %c0_25 = arith.constant 0 : index
      %c0_26 = arith.constant 0 : index
      %42 = vector.load %arg9[%c0_25, %c0_26] : memref<1x128xf32, #tpu.memory_space<vmem>>, vector<1x128xf32>
      %43 = vector.broadcast %42 : vector<1x128xf32> to vector<128x128xf32>
      %44 = arith.addf %41, %43 : vector<128x128xf32>
      %cst_27 = arith.constant dense<0.000000e+00> : vector<128xf32>
      %45 = vector.multi_reduction <add>, %44, %cst_27 [1] : vector<128x128xf32> to vector<128xf32>
      %46 = vector.shape_cast %45 : vector<128xf32> to vector<128x1xf32>
      %cst_28 = arith.constant 1.280000e+02 : f32
      %47 = vector.broadcast %cst_28 : f32 to vector<128x1xf32>
      %48 = arith.divf %46, %47 : vector<128x1xf32>
      %49 = vector.broadcast %48 : vector<128x1xf32> to vector<128x128xf32>
      %50 = arith.subf %44, %49 : vector<128x128xf32>
      %51 = arith.mulf %50, %50 : vector<128x128xf32>
      %cst_29 = arith.constant dense<0.000000e+00> : vector<128xf32>
      %52 = vector.multi_reduction <add>, %51, %cst_29 [1] : vector<128x128xf32> to vector<128xf32>
      %53 = vector.shape_cast %52 : vector<128xf32> to vector<128x1xf32>
      %cst_30 = arith.constant 1.280000e+02 : f32
      %54 = vector.broadcast %cst_30 : f32 to vector<128x1xf32>
      %55 = arith.divf %53, %54 : vector<128x1xf32>
      %56 = vector.broadcast %48 : vector<128x1xf32> to vector<128x128xf32>
      %57 = arith.subf %44, %56 : vector<128x128xf32>
      %cst_31 = arith.constant 9.99999974E-6 : f32
      %58 = vector.broadcast %cst_31 : f32 to vector<128x1xf32>
      %59 = arith.addf %55, %58 : vector<128x1xf32>
      %60 = math.rsqrt %59 : vector<128x1xf32>
      %61 = vector.broadcast %60 : vector<128x1xf32> to vector<128x128xf32>
      %62 = arith.mulf %57, %61 : vector<128x128xf32>
      %c0_32 = arith.constant 0 : index
      %c0_33 = arith.constant 0 : index
      %63 = vector.load %arg10[%c0_32, %c0_33] : memref<1x128xf32, #tpu.memory_space<vmem>>, vector<1x128xf32>
      %64 = vector.broadcast %63 : vector<1x128xf32> to vector<128x128xf32>
      %65 = arith.mulf %62, %64 : vector<128x128xf32>
      %c0_34 = arith.constant 0 : index
      %c0_35 = arith.constant 0 : index
      %66 = vector.load %arg11[%c0_34, %c0_35] : memref<1x128xf32, #tpu.memory_space<vmem>>, vector<1x128xf32>
      %67 = vector.broadcast %66 : vector<1x128xf32> to vector<128x128xf32>
      %68 = arith.addf %65, %67 : vector<128x128xf32>
      %69 = arith.addf %68, %21 : vector<128x128xf32>
      %c0_36 = arith.constant 0 : index
      %c0_37 = arith.constant 0 : index
      %70 = vector.load %arg12[%c0_36, %c0_37] : memref<128x128xf32, #tpu.memory_space<vmem>>, vector<128x128xf32>
      tpu.vector_store %arg12[%c0_36, %c0_37], %69 {strides = array<i32>} : memref<128x128xf32, #tpu.memory_space<vmem>>, vector<128x128xf32>,
    } else {
    }
    return
  }
  func.func @transform_0(%arg0: i32, %arg1: i32) -> (i32, i32) {
    %c0_i32 = arith.constant 0 : i32
    %c0_i32_0 = arith.constant 0 : i32
    return %c0_i32, %arg1 : i32, i32
  }
  func.func @transform_1(%arg0: i32, %arg1: i32) -> (i32, i32) {
    %c0_i32 = arith.constant 0 : i32
    %c0_i32_0 = arith.constant 0 : i32
    return %arg0, %c0_i32 : i32, i32
  }
  func.func @transform_2(%arg0: i32, %arg1: i32) -> (i32, i32) {
    %c0_i32 = arith.constant 0 : i32
    %c0_i32_0 = arith.constant 0 : i32
    return %arg1, %c0_i32 : i32, i32
  }
  func.func @transform_3(%arg0: i32, %arg1: i32) -> (i32, i32) {
    %c0_i32 = arith.constant 0 : i32
    %c0_i32_0 = arith.constant 0 : i32
    %c0_i32_1 = arith.constant 0 : i32
    return %c0_i32, %c0_i32_0 : i32, i32
  }
  func.func @transform_4(%arg0: i32, %arg1: i32) -> (i32, i32) {
    %c0_i32 = arith.constant 0 : i32
    %c0_i32_0 = arith.constant 0 : i32
    %c0_i32_1 = arith.constant 0 : i32
    return %c0_i32, %c0_i32_0 : i32, i32
  }
  func.func @transform_5(%arg0: i32, %arg1: i32) -> (i32, i32) {
    %c0_i32 = arith.constant 0 : i32
    %c0_i32_0 = arith.constant 0 : i32
    %c0_i32_1 = arith.constant 0 : i32
    return %c0_i32, %c0_i32_0 : i32, i32
  }
  func.func @transform_6(%arg0: i32, %arg1: i32) -> (i32, i32) {
    %c0_i32 = arith.constant 0 : i32
    %c0_i32_0 = arith.constant 0 : i32
    %c0_i32_1 = arith.constant 0 : i32
    return %c0_i32, %c0_i32_0 : i32, i32
  }
  func.func @transform_7(%arg0: i32, %arg1: i32) -> (i32, i32) {
    %c0_i32 = arith.constant 0 : i32
    %c0_i32_0 = arith.constant 0 : i32
    %c0_i32_1 = arith.constant 0 : i32
    return %c0_i32, %c0_i32_0 : i32, i32
  }
  func.func @transform_8(%arg0: i32, %arg1: i32) -> (i32, i32) {
    %c0_i32 = arith.constant 0 : i32
    %c0_i32_0 = arith.constant 0 : i32
    %c0_i32_1 = arith.constant 0 : i32
    return %c0_i32, %c0_i32_0 : i32, i32
  }
  func.func @transform_9(%arg0: i32, %arg1: i32) -> (i32, i32) {
    %c0_i32 = arith.constant 0 : i32
    %c0_i32_0 = arith.constant 0 : i32
    %c0_i32_1 = arith.constant 0 : i32
    return %c0_i32, %c0_i32_0 : i32, i32
  }
  func.func @transform_10(%arg0: i32, %arg1: i32) -> (i32, i32) {
    %c0_i32 = arith.constant 0 : i32
    %c0_i32_0 = arith.constant 0 : i32
    return %arg0, %c0_i32 : i32, i32
  }
}

</mosaic_0001>

<bundles_post_ra>
// kernel: tpu_custom_call.1
= control target key start
LH: loop header
LB: loop body
LE: loop exit
PB: predicated region body
PF: predicated region fallthrough
CT: control target
= control target key end

     0   :  { %s4565_s0 = inlined_call_operand.hbm [shape: s32[1,1024], index: 0, kind: input, shape index: {}]   ;;  %s4566_s1 = inlined_call_operand.hbm [shape: f32[256,128], index: 1, kind: input, shape index: {}]   ;;  %s4567_s2 = inlined_call_operand.hbm [shape: bf16[1024,128], index: 2, kind: input, shape index: {}]   ;;  %s4568_s3 = inlined_call_operand.hbm [shape: bf16[128,128], index: 3, kind: input, shape index: {}]   ;;  %s4569_s4 = inlined_call_operand.hbm [shape: bf16[128,128], index: 4, kind: input, shape index: {}]   ;;  %s4570_s5 = inlined_call_operand.vmem [shape: f32[1,128], index: 5, kind: input, shape index: {}]   ;;  %s4571_s6 = inlined_call_operand.hbm [shape: bf16[128,128], index: 6, kind: input, shape index: {}]   ;;  %s4572_s7 = inlined_call_operand.vmem [shape: f32[1,128], index: 7, kind: input, shape index: {}]   ;;  %s4573_s8 = inlined_call_operand.vmem [shape: f32[1,128], index: 8, kind: input, shape index: {}]   ;;  %s4574_s9 = inlined_call_operand.vmem [shape: f32[1,128], index: 9, kind: input, shape index: {}]   ;;  %s4575_s10 = inlined_call_operand.hbm [shape: f32[256,128], index: 10, kind: output, shape index: {}]  }
   0x1   :  { %4598 = sst [smem:[#allocation29_spill]] %s4565_s0 }
   0x2   :  { %4599 = sst [smem:[#allocation30_spill]] %s4566_s1 }
   0x3   :  { %4600 = sst [smem:[#allocation31_spill]] %s4568_s3 }
   0x4   :  { %4601 = sst [smem:[#allocation32_spill]] %s4569_s4 }
   0x5   :  { %4602 = sst [smem:[#allocation33_spill]] %s4570_s5 }
   0x6   :  { %4603 = sst [smem:[#allocation34_spill]] %s4572_s7 }
   0x7   :  { %4604 = sst [smem:[#allocation35_spill]] %s4573_s8 }
   0x8   :  { %4605 = sst [smem:[#allocation36_spill]] %s4574_s9 }
   0x9   :  { %4606 = sst [smem:[#allocation37_spill]] %s4575_s10 }
   0xa   :  { %15 = vsyncpa [#allocation4], 0 }
   0xb   :  { %17 = vsyncpa [#allocation4 + $0x1], 0 }
   0xc   :  { %18 = vsyncpa [#allocation7], 0 }
   0xd   :  { %20 = vsyncpa [#allocation7 + $0x1], 0 }
   0xe   :  { %21 = vsyncpa [#allocation10], 0 }
   0xf   :  { %22 = vsyncpa [#allocation13], 0 }
  0x10   :  { %23 = vsyncpa [#allocation5], 0 }
  0x11   :  { %25 = vsyncpa [#allocation5 + $0x1], 0  ;;  %s3618_s13 = smov 0   ;;  %s3620_s14 = smov 0  }
  0x12   :  { %s3622_s15 = smov 0   ;;  %s3624_s16 = smov 0  }
  0x13   :  { %s3626_s17 = smov 0   ;;  %s3628_s18 = smov 0  }
  0x14   :  { %s3630_s19 = smov 0   ;;  %s3632_s20 = smov 0  }
  0x15   :  { %s3634_s21 = smov 0   ;;  %s3636_s22 = smov 0  }
  0x16   :  { %s3638_s23 = smov 0  }
  0x17 LB: > { %4607 = sst [smem:[#allocation21_spill]] %s3506_s13  ;;  %s3674_s24 = sadd.s32 4294967295, %s3546_s23   ;;  %s3546_s23 = sphi %s3638_s23, %s31_s23   ;;  %s3542_s22 = sphi %s3636_s22, %s4674_s22   ;;  %s3538_s21 = sphi %s3634_s21, %s4673_s21   ;;  %s3534_s20 = sphi %s3632_s20, %s4672_s20   ;;  %s3530_s19 = sphi %s3630_s19, %s4671_s19   ;;  %s3526_s18 = sphi %s3628_s18, %s4670_s18   ;;  %s3522_s17 = sphi %s3626_s17, %s4669_s17   ;;  %s3518_s16 = sphi %s3624_s16, %s4668_s16   ;;  %s3514_s15 = sphi %s3622_s15, %s4667_s15   ;;  %s3510_s14 = sphi %s3620_s14, %s4666_s14   ;;  %s3506_s13 = sphi %s3618_s13, %s4665_s13  }
  0x18   : > { %4608 = sst [smem:[#allocation22_spill]] %s3510_s14  ;;  %s2404_s25 = sadd.s32 4294967294, %s3546_s23  }
  0x19   : > { %4609 = sst [smem:[#allocation23_spill]] %s3530_s19  ;;  %p4579_p0 = scmp.eq.s32.totalorder %s3674_s24, 0 }
  0x1a   : > { %4610 = sst [smem:[#allocation24_spill]] %s3534_s20  ;;  %p89_p1 = scmp.ne.s32.totalorder %s3510_s14, %s3506_s13 }
  0x1b   : > { %p292_p3 = scmp.eq.s32.totalorder %s2404_s25, 3  ;;  %p2405_p5 = scmp.ge.s32.totalorder %s3546_s23, 1 }
  0x1c   : > { %p3683_p4 = por %p89_p1, %p4579_p0  ;;  %p299_p7 = scmp.lt.s32.totalorder %s3546_s23, 5 }
  0x1d   : > { %p3688_p6 = por %p292_p3, %p89_p1  ;;  %s3548_s29 = smov [#allocation9]  }
  0x1e   : > { %s4611_s26 = scalar_select %p3683_p4, 1, 0 }
  0x1f   : > { %s4613_s27 = scalar_select %p3688_p6, 1, 0 }
  0x20   : > { %4612 = sst [smem:[#allocation25_spill]] %s4611_s26  ;;  %p3693_p8 = pnand %p2405_p5, %p299_p7 }
  0x21   : > { %4614 = sst [smem:[#allocation26_spill]] %s4613_s27  ;;  %s311_s30 = sshll.u32 %s3548_s29, 4  ;;  %s312_s30 = int_to_ptr.vmem [resolvable:$true] %s311_s30 }
  0x22   : > { %s4615_s28 = scalar_select %p3693_p8, 1, 0 }
  0x23   : > { %p2951_p9 = pneg %p3693_p8  ;;  %s4618_s3 = sld [smem:[#allocation31_spill]] }
  0x24   : > { %4616 = sst [smem:[#allocation27_spill]] %s4615_s28 }
  0x25   : > { %p3701_p10 = pnand %p2951_p9, %p4579_p0 }
  0x27   : > { %s4617_s11 = scalar_select %p3701_p10, 1, 0 }
  0x28   : > { %p3714_p12 = pneg %p3701_p10 }
  0x29   : > { %s3234_s13 = scalar_lea.hbm %s4618_s3, 1024 }
  0x2a   : > { %p3235_p11 = scmp.ne.s32.totalorder %s4618_s3, %s3234_s13  ;;  %p3241_p3 = scmp.lt.u32.totalorder %s3234_s13, %s4618_s3 }
  0x2c   : > { %p3237_p13 = pnand %p3714_p12, %p3235_p11 }
  0x2e   : > { %p3238_p1 = pneg %p3237_p13 }
  0x30   : > { %p3243_p5 = pnand %p3241_p3, %p3238_p1 }
  0x32   : > { %3246 = shalt.err (!%p3243_p5)
}
  0x33   : > { %s3247_s27 = scalar_lea.vmem %s312_s30, 1024  ;;  %p3255_p2 = scmp.lt.s32.totalorder %s312_s30, %s312_s30 }
  0x34   : > { %p3248_p7 = scmp.ne.s32.totalorder %s312_s30, %s3247_s27  ;;  %p3256_p6 = scmp.lt.s32.totalorder %s3247_s27, %s3247_s27 }
  0x36   : > { %p3250_p9 = pnand %p3248_p7, %p3714_p12  ;;  %p3257_p4 = por %p3256_p6, %p3255_p2 }
  0x38   : > { %p3251_p0 = pneg %p3250_p9 }
  0x3a   : > { %p3258_p8 = pnand %p3257_p4, %p3251_p0 }
  0x3c   : > { %3261 = shalt.err (!%p3258_p8)
}
  0x3d   : > { %s4584_s9 = smov 64   ;;  %s4591_s7 = smov 4  }
  0x3e   : > { %2954 = dma.hbm_to_vmem [thread:$0]  (!%p3701_p10), %s4618_s3, 1024, %s312_s30, [#allocation10], %s4584_s9, %s4584_s9, %s4591_s7  }
  0x3f   : > { %p4587_p0 = scmp.eq.s32.totalorder %s3546_s23, 0  ;;  %p83_p2 = scmp.ne.s32.totalorder %s3514_s15, %s3510_s14 }
  0x40   : > { %p4586_p4 = scmp.lt.s32.totalorder %s3546_s23, 4  ;;  %s382_s25 = sand.u32 1, %s3546_s23  }
  0x41   : > { %s384_s27 = sand.u32 1, %s3514_s15   ;;  %p85_p6 = por %p83_p2, %p4587_p0 }
  0x42   : > { %p4620_p8 = scmp.eq.s32.totalorder %s3674_s24, 3  ;;  %s2413_s5 = sshll.u32 %s384_s27, 7 }
  0x43   : > { %s2640_s20 = sshll.u32 %s3542_s22, 11  ;;  %s4623_s1 = sld [smem:[#allocation30_spill]] }
  0x44   : > { %p3744_p11 = por %p4620_p8, %p83_p2  ;;  %s386_s30 = scalar_lea.vmem [#allocation6], %s2413_s5 }
  0x45   : > { %s393_s10 = sshll.u32 %s386_s30, 4  ;;  %p3758_p13 = pnand %p4586_p4, %p85_p6  ;;  %s3754_s10 = int_to_ptr.vmem [resolvable:$true] %s393_s10 }
  0x46   : > { %s4621_s12 = scalar_select %p3744_p11, 1, 0 }
  0x47   : > { %s3762_s27 = scalar_lea.sflag [#allocation7], %s382_s25  ;;  %p3264_p3 = pneg %p3758_p13 }
  0x48   : > { %4622 = sst [smem:[#allocation28_spill]] %s4621_s12 }
  0x49   : > { %s3752_s8 = scalar_lea.hbm %s4623_s1, %s2640_s20  ;;  %s3267_s26 = scalar_lea.hbm %s4623_s1, 4096 }
  0x4a   : > { %s3262_s19 = scalar_lea.hbm %s3752_s8, 2048  ;;  %p3268_p9 = scmp.lt.u32.totalorder %s3752_s8, %s4623_s1 }
  0x4b   : > { %p3263_p1 = scmp.ne.s32.totalorder %s3752_s8, %s3262_s19  ;;  %p3269_p2 = scmp.lt.u32.totalorder %s3267_s26, %s3262_s19 }
  0x4c   : > { %p3271_p8 = scmp.lt.u32.totalorder %s3262_s19, %s3752_s8 }
  0x4d   : > { %p3265_p5 = pnand %p3264_p3, %p3263_p1  ;;  %p3270_p6 = por %p3269_p2, %p3268_p9 }
  0x4f   : > { %p3266_p7 = pneg %p3265_p5  ;;  %p3272_p4 = por %p3271_p8, %p3270_p6 }
  0x51   : > { %p3273_p0 = pnand %p3272_p4, %p3266_p7 }
  0x53   : > { %3276 = shalt.err (!%p3273_p0)
}
  0x54   : > { %s3277_s25 = scalar_lea.vmem %s3754_s10, 2048  ;;  %s3551_s5 = smov [#allocation6]  }
  0x55   : > { %p3278_p1 = scmp.ne.s32.totalorder %s3754_s10, %s3277_s25  ;;  %s3282_s20 = sshll.u32 %s3551_s5, 4  ;;  %s3283_s20 = int_to_ptr.vmem [resolvable:$false] %s3282_s20 }
  0x56   : > { %s3284_s9 = scalar_lea.vmem %s3283_s20, 4096  ;;  %p3285_p10 = scmp.lt.s32.totalorder %s3754_s10, %s3283_s20 }
  0x57   : > { %p3280_p5 = pnand %p3278_p1, %p3264_p3  ;;  %p3286_p9 = scmp.lt.s32.totalorder %s3284_s9, %s3277_s25 }
  0x59   : > { %p3281_p11 = pneg %p3280_p5  ;;  %p3287_p2 = por %p3286_p9, %p3285_p10 }
  0x5b   : > { %p3288_p6 = pnand %p3287_p2, %p3281_p11 }
  0x5d   : > { %3291 = shalt.err (!%p3288_p6)
}
  0x5e   : > { %s3552_s19 = smov 128   ;;  %s3553_s26 = smov 8  }
  0x5f   : > { %2967 = dma.hbm_to_vmem [thread:$0]  (!%p3758_p13), %s3752_s8, 2048, %s3754_s10, %s3762_s27, %s3552_s19, %s3552_s19, %s3553_s26  }
  0x60   : > { %s3554_s30 = smov [#allocation11]   ;;  %s3555_s5 = smov [#allocation12]  }
  0x61   : > { %s324_s7 = sshll.u32 %s3554_s30, 4  ;;  %s340_s1 = sshll.u32 %s3555_s5, 4  ;;  %s325_s7 = int_to_ptr.vmem [resolvable:$true] %s324_s7  ;;  %s341_s1 = int_to_ptr.vmem [resolvable:$true] %s340_s1 }
  0x62   : > { %s4625_s4 = sld [smem:[#allocation32_spill]] }
  0x68   : > { %s3292_s25 = scalar_lea.hbm %s4625_s4, 1024 }
  0x69   : > { %p3293_p10 = scmp.ne.s32.totalorder %s4625_s4, %s3292_s25  ;;  %p3299_p11 = scmp.lt.u32.totalorder %s3292_s25, %s4625_s4 }
  0x6b   : > { %p3295_p0 = pnand %p3293_p10, %p3714_p12 }
  0x6d   : > { %p3296_p4 = pneg %p3295_p0 }
  0x6f   : > { %p3301_p13 = pnand %p3299_p11, %p3296_p4 }
  0x71   : > { %3304 = shalt.err (!%p3301_p13)
}
  0x72   : > { %s3305_s13 = scalar_lea.vmem %s325_s7, 1024  ;;  %p3313_p1 = scmp.lt.s32.totalorder %s325_s7, %s325_s7 }
  0x73   : > { %p3306_p3 = scmp.ne.s32.totalorder %s325_s7, %s3305_s13  ;;  %p3314_p5 = scmp.lt.s32.totalorder %s3305_s13, %s3305_s13 }
  0x75   : > { %p3308_p7 = pnand %p3306_p3, %p3714_p12  ;;  %p3315_p9 = por %p3314_p5, %p3313_p1 }
  0x77   : > { %p3309_p8 = pneg %p3308_p7 }
  0x79   : > { %p3316_p2 = pnand %p3315_p9, %p3309_p8 }
  0x7b   : > { %3319 = shalt.err (!%p3316_p2)
}
  0x7c   : > { %p4626_p6 = scmp.ne.s32.totalorder %s4617_s11, 0  ;;  %s4627_s3 = smov 4  }
  0x7d   : > { %s4628_s12 = smov 64   ;;  %s3320_s19 = scalar_lea.hbm %s4571_s6, 1024 }
  0x7e   : > { %2957 = dma.hbm_to_vmem [thread:$0]  (!%p4626_p6), %s4625_s4, 1024, %s325_s7, [#allocation10], %s4628_s12, %s4628_s12, %s4627_s3  }
  0x7f   : > { %p3321_p10 = scmp.ne.s32.totalorder %s4571_s6, %s3320_s19  ;;  %p3327_p11 = scmp.lt.u32.totalorder %s3320_s19, %s4571_s6 }
  0x81   : > { %p3323_p0 = pnand %p3321_p10, %p3714_p12 }
  0x83   : > { %p3324_p4 = pneg %p3323_p0 }
  0x85   : > { %p3329_p13 = pnand %p3327_p11, %p3324_p4 }
  0x87   : > { %3332 = shalt.err (!%p3329_p13)
}
  0x88   : > { %s3333_s25 = scalar_lea.vmem %s341_s1, 1024  ;;  %p3341_p1 = scmp.lt.s32.totalorder %s341_s1, %s341_s1 }
  0x89   : > { %p3334_p3 = scmp.ne.s32.totalorder %s341_s1, %s3333_s25  ;;  %p3342_p5 = scmp.lt.s32.totalorder %s3333_s25, %s3333_s25 }
  0x8b   : > { %p3336_p7 = pnand %p3334_p3, %p3714_p12  ;;  %p3343_p9 = por %p3342_p5, %p3341_p1 }
  0x8d   : > { %p3337_p8 = pneg %p3336_p7 }
  0x8f   : > { %p3344_p2 = pnand %p3343_p9, %p3337_p8 }
  0x91   : > { %3347 = shalt.err (!%p3344_p2)
}
  0x92   : > { %2960 = dma.hbm_to_vmem [thread:$0]  (!%p4626_p6), %s4571_s6, 1024, %s341_s1, [#allocation13], %s4628_s12, %s4628_s12, %s4627_s3  }
  0x93   : > { %s40_s11 = sadd.s32 1, %s3538_s21  ;;  %s50_s29 = sadd.s32 1, %s3526_s18 }
  0x94   : > { %p41_p12 = scmp.ge.s32.totalorder %s40_s11, 2  ;;  %p57_p10 = scmp.ne.s32.totalorder %s3526_s18, %s3522_s17 }
  0x95   : > { %p63_p0 = scmp.ne.s32.totalorder %s3522_s17, %s3518_s16  ;;  %s4629_s13 = sadd.s32 1, %s3542_s22 }
  0x96   : > { %s4676_s11 = smov (%p41_p12, %s40_s11), 0  ;;  %s4678_s13 = smov (!%p41_p12, %s4629_s13), %s3542_s22 }
  0x97   : > { %s47_s14 = ssub.s32 %s3538_s21, %s4676_s11  ;;  %p4630_p4 = scmp.eq.s32.totalorder %s3546_s23, 0 }
  0x98   : > { %p45_p6 = scmp.ge.s32.totalorder %s4678_s13, 2  ;;  %p48_p13 = scmp.eq.s32.totalorder %s47_s14, 0 }
  0x99   : > { %p3847_p11 = por %p4630_p4, %p57_p10  ;;  %p4632_p3 = scmp.eq.s32.totalorder %s3674_s24, 0 }
  0x9a   : > { %s3858_s16 = sand.u32 1, %s3526_s18   ;;  %s4680_s13 = smov (%p45_p6, %s4678_s13), 0 }
  0x9b   : > { %p3853_p7 = por %p4632_p3, %p63_p0  ;;  %s73_s10 = ssub.s32 %s3542_s22, %s4680_s13 }
  0x9c   : > { %s3863_s8 = scalar_select %p48_p13, %s3526_s18, %s50_s29  }
  0x9d   : > { %p74_p8 = scmp.eq.s32.totalorder %s73_s10, 0  ;;  %s2410_s19 = sshll.u32 %s3858_s16, 2 }
  0x9e   : > { %s2639_s26 = sshll.u32 %s3538_s21, 6  ;;  %s4634_s30 = sadd.s32 1, %s3514_s15 }
  0x9f   : > { %s3872_s5 = scalar_select %p74_p8, %s3514_s15, %s4634_s30  }
  0xa0   : > { %s4635_s0 = sld [smem:[#allocation29_spill]]  ;;  %s367_s9 = scalar_lea.vmem [#allocation3], %s2410_s19 }
  0xa1   : > { %s375_s14 = sshll.u32 %s367_s9, 4  ;;  %p4636_p1 = scmp.lt.s32.totalorder %s3546_s23, 4  ;;  %s3879_s14 = int_to_ptr.vmem [resolvable:$true] %s375_s14 }
  0xa2   : > { %s2416_s10 = sshll.u32 %s3858_s16, 8 }
  0xa3   : > { %p3885_p5 = pnand %p4636_p1, %p3847_p11 }
  0xa5   : > { %p3350_p2 = pneg %p3885_p5 }
  0xa6   : > { %s3877_s7 = scalar_lea.hbm %s4635_s0, %s2639_s26  ;;  %s364_s26 = scalar_lea.sflag [#allocation4], %s3858_s16 }
  0xa7   : > { %s3348_s20 = scalar_lea.hbm %s3877_s7, 64  ;;  %s3353_s25 = scalar_lea.hbm %s4635_s0, 128 }
  0xa8   : > { %p3349_p9 = scmp.ne.s32.totalorder %s3877_s7, %s3348_s20  ;;  %p3354_p0 = scmp.lt.u32.totalorder %s3877_s7, %s4635_s0 }
  0xa9   : > { %p3355_p4 = scmp.lt.u32.totalorder %s3353_s25, %s3348_s20  ;;  %p3357_p6 = scmp.lt.u32.totalorder %s3348_s20, %s3877_s7 }
  0xaa   : > { %p3351_p12 = pnand %p3350_p2, %p3349_p9 }
  0xab   : > { %p3356_p11 = por %p3355_p4, %p3354_p0 }
  0xac   : > { %p3352_p10 = pneg %p3351_p12 }
  0xad   : > { %p3358_p13 = por %p3357_p6, %p3356_p11 }
  0xaf   : > { %p3359_p3 = pnand %p3358_p13, %p3352_p10 }
  0xb1   : > { %3362 = shalt.err (!%p3359_p3)
}
  0xb2   : > { %s3363_s30 = scalar_lea.vmem %s3879_s14, 64  ;;  %s3556_s19 = smov [#allocation3]  }
  0xb3   : > { %p3364_p8 = scmp.ne.s32.totalorder %s3879_s14, %s3363_s30  ;;  %s3368_s28 = sshll.u32 %s3556_s19, 4  ;;  %s3369_s28 = int_to_ptr.vmem [resolvable:$false] %s3368_s28 }
  0xb4   : > { %s3370_s4 = scalar_lea.vmem %s3369_s28, 128  ;;  %p3371_p12 = scmp.lt.s32.totalorder %s3879_s14, %s3369_s28 }
  0xb5   : > { %p3366_p1 = pnand %p3364_p8, %p3350_p2  ;;  %p3372_p0 = scmp.lt.s32.totalorder %s3370_s4, %s3363_s30 }
  0xb7   : > { %p3367_p9 = pneg %p3366_p1  ;;  %p3373_p4 = por %p3372_p0, %p3371_p12 }
  0xb9   : > { %p3374_p11 = pnand %p3373_p4, %p3367_p9 }
  0xbb   : > { %3377 = shalt.err (!%p3374_p11)
}
  0xbc   : > { %2964 = dma.hbm_to_vmem [thread:$0]  (!%p3885_p5), %s3877_s7, 64, %s3879_s14, %s364_s26  }
  0xbd   : > { %s407_s20 = scalar_lea.vmem [#allocation8], %s2416_s10  ;;  %s4638_s9 = sshll.u32 %s3538_s21, 12 }
  0xbe   : > { %s414_s25 = sshll.u32 %s407_s20, 4  ;;  %s3924_s28 = scalar_lea.hbm %s4567_s2, %s4638_s9  ;;  %s3926_s25 = int_to_ptr.vmem [resolvable:$true] %s414_s25 }
  0xbf   : > { %s3378_s30 = scalar_lea.hbm %s3924_s28, 4096  ;;  %s3383_s14 = scalar_lea.hbm %s4567_s2, 8192 }
  0xc0   : > { %p3379_p10 = scmp.ne.s32.totalorder %s3924_s28, %s3378_s30  ;;  %p3384_p3 = scmp.lt.u32.totalorder %s3924_s28, %s4567_s2 }
  0xc1   : > { %p3385_p8 = scmp.lt.u32.totalorder %s3383_s14, %s3378_s30  ;;  %p3387_p9 = scmp.lt.u32.totalorder %s3378_s30, %s3924_s28 }
  0xc2   : > { %p3381_p6 = pnand %p3379_p10, %p3350_p2 }
  0xc3   : > { %p3386_p1 = por %p3385_p8, %p3384_p3 }
  0xc4   : > { %p3382_p13 = pneg %p3381_p6 }
  0xc5   : > { %p3388_p12 = por %p3387_p9, %p3386_p1 }
  0xc7   : > { %p3389_p0 = pnand %p3388_p12, %p3382_p13 }
  0xc9   : > { %3392 = shalt.err (!%p3389_p0)
}
  0xca   : > { %s3393_s26 = scalar_lea.vmem %s3926_s25, 4096  ;;  %s3557_s4 = smov [#allocation8]  }
  0xcb   : > { %p3394_p4 = scmp.ne.s32.totalorder %s3926_s25, %s3393_s26  ;;  %s3398_s20 = sshll.u32 %s3557_s4, 4  ;;  %s3399_s20 = int_to_ptr.vmem [resolvable:$false] %s3398_s20 }
  0xcc   : > { %s3400_s9 = scalar_lea.vmem %s3399_s20, 8192  ;;  %p3401_p6 = scmp.lt.s32.totalorder %s3926_s25, %s3399_s20 }
  0xcd   : > { %p3396_p11 = pnand %p3394_p4, %p3350_p2  ;;  %p3402_p3 = scmp.lt.s32.totalorder %s3400_s9, %s3393_s26 }
  0xcf   : > { %p3397_p10 = pneg %p3396_p11  ;;  %p3403_p8 = por %p3402_p3, %p3401_p6 }
  0xd1   : > { %p3404_p1 = pnand %p3403_p8, %p3397_p10 }
  0xd3   : > { %3407 = shalt.err (!%p3404_p1)
}
  0xd4   : > { %2970 = dma.hbm_to_vmem [thread:$0]  (!%p3885_p5), %s3924_s28, 4096, %s3926_s25, %s3762_s27, %s4628_s12, %s4628_s12, %s4627_s3  }
  0xd5   : > { %s4639_s19 = sld [smem:[#allocation27_spill]] }
  0xdb   : > { %p4640_p2 = scmp.ne.s32.totalorder %s4639_s19, 0 }
  0xdc   : > { %s428_s30 = sand.u32 (!%p4640_p2), 1, %s3522_s17  }
  0xdd   : > { %426 = sbr.rel (%p4640_p2) target bundleno = 1447 (0x5a7), region = 60  ;;  %s2420_s16 = sshll.u32 (!%p4640_p2), %s428_s30, 2 }
  0xde   : > { %s429_s7 = scalar_lea.sflag (!%p4640_p2), [#allocation4], %s428_s30  ;;  %s3958_s14 = scalar_lea.vmem (!%p4640_p2), [#allocation3], %s2420_s16 }
  0xe4   : > { %3481 = dma.done.wait (%p3853_p7), %s429_s7, 64  }
  0xe5   : > { %3483 = vsyncadd (%p3853_p7), %s429_s7, 4294967232  ;;  %s4641_s29 = sld [smem:[#allocation22_spill]]  ;;  %s4642_s10 = sld [smem:[#allocation25_spill]] }
  0xe6   : > { %s437_s27 = sand.u32 1, %s3674_s24  }
  0xe7   : > { %s438_s25 = scalar_lea.sflag [#allocation7], %s437_s27 }
  0xeb   : > { %s439_s3 = sand.u32 1, %s4641_s29   ;;  %p4643_p5 = scmp.ne.s32.totalorder %s4642_s10, 0 }
  0xec   : > { %s2421_s12 = sshll.u32 %s439_s3, 7 }
  0xed   : > { %s3968_s28 = scalar_lea.vmem [#allocation6], %s2421_s12 }
  0xee   : > { %3485 = dma.done.wait (%p4643_p5), %s438_s25, 2048  }
  0xef   : > { %3487 = vsyncadd (%p4643_p5), %s438_s25, 4294965248  ;;  %s2422_s0 = sshll.u32 %s428_s30, 8 }
  0xf0   : > { %s3974_s26 = scalar_lea.vmem [#allocation8], %s2422_s0 }
  0xf1   : > { %3489 = dma.done.wait (%p3853_p7), %s438_s25, 4096  }
  0xf2   : > { %3491 = vsyncadd (%p3853_p7), %s438_s25, 4294963200  ;;  %p4644_p13 = scmp.eq.s32.totalorder %s3674_s24, 0 }
  0xf4   : > { %3493 = dma.done.wait (%p4644_p13), [#allocation10], 2048   ;;  %p4645_p9 = pmov %p4644_p13 }
  0xf6   : > { %3495 = vsyncadd (%p4645_p9), [#allocation10], 4294965248  ;;  %p4646_p12 = pmov %p4645_p9 }
  0xf7   : > { %p4647_p0 = pmov %p4645_p9 }
  0xf8   : > { %3497 = dma.done.wait (%p4646_p12), [#allocation13], 1024  }
  0xf9   : > { %3499 = vsyncadd (%p4647_p0), [#allocation13], 4294966272  ;;  %s3988_s4 = scalar_lea.vmem [#allocation14], %s2421_s12  ;;  %s4648_s20 = sld [smem:[#allocation23_spill]] }
  0xff   : > { %p2427_p4 = scmp.ne.s32.totalorder %s4648_s20, 0 }
 0x100   : > { %v3558_v0 = vmov (!%p2427_p4), 0.0  }
 0x101   : > { %517 = sbr.rel (%p2427_p4) target bundleno = 265 (0x109), region = 88  ;;  %518 = vst [vmem:[#allocation2] sm:$0xff] (!%p2427_p4), %v3558_v0  ;;  %519 = vst [vmem:[#allocation2 + $0x8] sm:$0xff] (!%p2427_p4), %v3558_v0 }
 0x102   : > { %520 = vst [vmem:[#allocation2 + $0x10] sm:$0xff] (!%p2427_p4), %v3558_v0  ;;  %521 = vst [vmem:[#allocation2 + $0x18] sm:$0xff] (!%p2427_p4), %v3558_v0 }
 0x103   : > { %522 = vst [vmem:[#allocation2 + $0x20] sm:$0xff] (!%p2427_p4), %v3558_v0  ;;  %523 = vst [vmem:[#allocation2 + $0x28] sm:$0xff] (!%p2427_p4), %v3558_v0 }
 0x104   : > { %524 = vst [vmem:[#allocation2 + $0x30] sm:$0xff] (!%p2427_p4), %v3558_v0  ;;  %525 = vst [vmem:[#allocation2 + $0x38] sm:$0xff] (!%p2427_p4), %v3558_v0 }
 0x105   : > { %526 = vst [vmem:[#allocation2 + $0x40] sm:$0xff] (!%p2427_p4), %v3558_v0  ;;  %527 = vst [vmem:[#allocation2 + $0x48] sm:$0xff] (!%p2427_p4), %v3558_v0 }
 0x106   : > { %528 = vst [vmem:[#allocation2 + $0x50] sm:$0xff] (!%p2427_p4), %v3558_v0  ;;  %529 = vst [vmem:[#allocation2 + $0x58] sm:$0xff] (!%p2427_p4), %v3558_v0 }
 0x107   : > { %530 = vst [vmem:[#allocation2 + $0x60] sm:$0xff] (!%p2427_p4), %v3558_v0  ;;  %531 = vst [vmem:[#allocation2 + $0x68] sm:$0xff] (!%p2427_p4), %v3558_v0 }
 0x108   : > { %532 = vst [vmem:[#allocation2 + $0x70] sm:$0xff] %v3558_v0  ;;  %533 = vst [vmem:[#allocation2 + $0x78] sm:$0xff] %v3558_v0 }
 0x109 PF: > { %v3082_v1 = vld [vmem:[%s3974_s26 + $0x40] sm:$0xff]   ;;  %v3086_v5 = vld [vmem:[%s3974_s26 + $0x48] sm:$0xff]   ;;  %v3090_v9 = vld [vmem:[%s3974_s26 + $0x50] sm:$0xff]   ;;  %v538_v22 = vlaneseq  ;;  %s4649_s24 = sld [smem:[#allocation24_spill]]  ;;  %v3559_v49 = vmov 1.0|1.0  }
 0x10a   : > { %v3083_v2 = vld [vmem:[%s3974_s26 + $0xc0] sm:$0xff]   ;;  %2643 = vmatprep.subr.bf16.mxu0 %v3082_v1  ;;  %v3087_v6 = vld [vmem:[%s3974_s26 + $0xc8] sm:$0xff]   ;;  %v3091_v10 = vld [vmem:[%s3974_s26 + $0xd0] sm:$0xff]   ;;  %s4650_s9 = sld [smem:[#allocation23_spill]] }
 0x10b   : > { %v3084_v3 = vld [vmem:[%s3974_s26] sm:$0xff]   ;;  %2707 = vmatprep.subr.bf16.mxu1 %v3083_v2  ;;  %v3088_v7 = vld [vmem:[%s3974_s26 + $0x8] sm:$0xff]   ;;  %v3092_v11 = vld [vmem:[%s3974_s26 + $0x10] sm:$0xff]   ;;  %v4016_v27 = vshrl.u32 %v538_v22, 7 }
 0x10c   : > { %v3085_v4 = vld [vmem:[%s3974_s26 + $0x80] sm:$0xff]   ;;  %2644 = vmatpush3.bf16.msra.mxu0 %v3084_v3  ;;  %v3089_v8 = vld [vmem:[%s3974_s26 + $0x88] sm:$0xff]   ;;  %v3093_v12 = vld [vmem:[%s3974_s26 + $0x90] sm:$0xff]  }
 0x10d   : > { %2708 = vmatpush3.bf16.msra.mxu1 %v3085_v4  ;;  %2645 = vmatprep.subr.bf16.mxu0 %v3086_v5  ;;  %v3094_v13 = vld [vmem:[%s3974_s26 + $0x58] sm:$0xff]   ;;  %v3098_v17 = vld [vmem:[%s3974_s26 + $0x60] sm:$0xff]   ;;  %v3102_v21 = vld [vmem:[%s3974_s26 + $0x68] sm:$0xff]   ;;  %v561_v32 = vsub.s32 1, %v4016_v27  ;;  %v569_v34 = vsub.s32 3, %v4016_v27  ;;  %v557_v37 = vsub.s32 0, %v4016_v27 }
 0x10e   : > { %2709 = vmatprep.subr.bf16.mxu1 %v3087_v6  ;;  %v3095_v14 = vld [vmem:[%s3974_s26 + $0xd8] sm:$0xff]   ;;  %v3099_v18 = vld [vmem:[%s3974_s26 + $0xe0] sm:$0xff]   ;;  %v3103_v23 = vld [vmem:[%s3974_s26 + $0xe8] sm:$0xff]   ;;  %v565_v39 = vsub.s32 2, %v4016_v27  ;;  %v540_v42 = vadd.s32 8, %v4016_v27  ;;  %v541_v43 = vadd.s32 16, %v4016_v27 }
 0x10f   : > { %v3096_v15 = vld [vmem:[%s3974_s26 + $0x18] sm:$0xff]   ;;  %v3100_v19 = vld [vmem:[%s3974_s26 + $0x20] sm:$0xff]   ;;  %v3104_v24 = vld [vmem:[%s3974_s26 + $0x28] sm:$0xff]   ;;  %s2428_s1 = sshll.u32 %s4649_s24, 7  ;;  %v542_v44 = vadd.s32 24, %v4016_v27  ;;  %v543_v50 = vadd.s32 32, %v4016_v27 }
 0x110   : > { %2646 = vmatpush3.bf16.msra.mxu0 %v3088_v7  ;;  %v3097_v16 = vld [vmem:[%s3974_s26 + $0x98] sm:$0xff]   ;;  %v3101_v20 = vld [vmem:[%s3974_s26 + $0xa0] sm:$0xff]   ;;  %v3105_v25 = vld [vmem:[%s3974_s26 + $0xa8] sm:$0xff]   ;;  %v536_v36 = vstv %s2428_s1  ;;  %v544_v51 = vadd.s32 40, %v4016_v27  ;;  %v545_v52 = vadd.s32 48, %v4016_v27  ;;  %v546_v53 = vadd.s32 56, %v4016_v27 }
 0x111   : > { %2710 = vmatpush3.bf16.msra.mxu1 %v3089_v8  ;;  %2647 = vmatprep.subr.bf16.mxu0 %v3090_v9  ;;  %v3106_v26 = vld [vmem:[%s3974_s26 + $0x70] sm:$0xff]   ;;  %v3110_v31 = vld [vmem:[%s3974_s26 + $0x78] sm:$0xff]   ;;  %v547_v54 = vadd.s32 64, %v4016_v27  ;;  %v548_v55 = vadd.s32 72, %v4016_v27  ;;  %v549_v56 = vadd.s32 80, %v4016_v27  ;;  %v550_v57 = vadd.s32 88, %v4016_v27 }
 0x112   : > { %2711 = vmatprep.subr.bf16.mxu1 %v3091_v10  ;;  %v3107_v28 = vld [vmem:[%s3974_s26 + $0xf0] sm:$0xff]   ;;  %v3111_v33 = vld [vmem:[%s3974_s26 + $0xf8] sm:$0xff]   ;;  %v551_v58 = vadd.s32 96, %v4016_v27  ;;  %v552_v59 = vadd.s32 104, %v4016_v27  ;;  %v553_v60 = vadd.s32 112, %v4016_v27  ;;  %v554_v61 = vadd.s32 120, %v4016_v27 }
 0x113   : > { %v3108_v29 = vld [vmem:[%s3974_s26 + $0x30] sm:$0xff]   ;;  %v3112_v35 = vld [vmem:[%s3974_s26 + $0x38] sm:$0xff]   ;;  %p2589_p7 = scmp.ne.s32.totalorder %s4650_s9, 1 }
 0x114   : > { %2648 = vmatpush3.bf16.msra.mxu0 %v3092_v11  ;;  %v3109_v30 = vld [vmem:[%s3974_s26 + $0xb0] sm:$0xff]   ;;  %v3113_v38 = vld [vmem:[%s3974_s26 + $0xb8] sm:$0xff]   ;;  %s4651_s16 = sld [smem:[#allocation33_spill]] (!%p2589_p7)  ;;  %s4652_s29 = sld [smem:[#allocation34_spill]] (!%p2589_p7) }
 0x115   : > { %2712 = vmatpush3.bf16.msra.mxu1 %v3093_v12  ;;  %2649 = vmatprep.subr.bf16.mxu0 %v3094_v13  ;;  %v534_v40 = vld [vmem:[%s3958_s14] sm:$0xf]  ;;  %v796_v12 = vld [vmem:[#allocation2 + $0x8] sm:$0xff]  ;;  %s4653_s12 = sld [smem:[#allocation35_spill]] (!%p2589_p7)  ;;  %s4654_s0 = sld [smem:[#allocation36_spill]] (!%p2589_p7) }
 0x116   : > { %2713 = vmatprep.subr.bf16.mxu1 %v3095_v14  ;;  %v537_v41 = vsub.s32 %v534_v40, %v536_v36  ;;  %v795_v7 = vld [vmem:[#allocation2] sm:$0xff] }
 0x118   : > { %2650 = vmatpush3.bf16.msra.mxu0 %v3096_v15  ;;  %v4034_v45 = vrot.slane %v537_v41, %v561_v32  ;;  %v4036_v46 = vrot.slane %v537_v41, %v569_v34  ;;  %v4038_v47 = vrot.slane %v537_v41, %v557_v37  ;;  %v4040_v48 = vrot.slane %v537_v41, %v565_v39 }
 0x119   : > { %2714 = vmatpush3.bf16.msra.mxu1 %v3097_v16  ;;  %2651 = vmatprep.subr.bf16.mxu0 %v3098_v17 }
 0x11a   : > { %2715 = vmatprep.subr.bf16.mxu1 %v3099_v18  ;;  %vm572_vm0 = vcmp.eq.s32.totalorder %v4016_v27, %v4034_v45  ;;  %vm576_vm1 = vcmp.eq.s32.totalorder %v540_v42, %v4034_v45  ;;  %vm574_vm2 = vcmp.eq.s32.totalorder %v4016_v27, %v4036_v46  ;;  %vm578_vm3 = vcmp.eq.s32.totalorder %v540_v42, %v4036_v46 }
 0x11b   : > { %vm2525_vm4 = vmpackc.low %vm576_vm1, %vm572_vm0  ;;  %vm571_vm5 = vcmp.eq.s32.totalorder %v4016_v27, %v4038_v47  ;;  %vm575_vm6 = vcmp.eq.s32.totalorder %v540_v42, %v4038_v47  ;;  %vm573_vm7 = vcmp.eq.s32.totalorder %v4016_v27, %v4040_v48  ;;  %vm577_vm8 = vcmp.eq.s32.totalorder %v540_v42, %v4040_v48 }
 0x11c   : > { %2652 = vmatpush3.bf16.msra.mxu0 %v3100_v19  ;;  %2526 = vmatprep.mubr.msk.bf16.mxu0 %vm2525_vm4, %v3559_v49  ;;  %vm2557_vm9 = vmpackc.low %vm578_vm3, %vm574_vm2  ;;  %vm580_vm10 = vcmp.eq.s32.totalorder %v541_v43, %v4034_v45  ;;  %vm584_vm11 = vcmp.eq.s32.totalorder %v542_v44, %v4034_v45  ;;  %vm582_vm13 = vcmp.eq.s32.totalorder %v541_v43, %v4036_v46 }
 0x11d   : > { %2716 = vmatpush3.bf16.msra.mxu1 %v3101_v20  ;;  %2653 = vmatprep.subr.bf16.mxu0 %v3102_v21  ;;  %vm2527_vm12 = vmpackc.low %vm575_vm6, %vm571_vm5  ;;  %vm586_vm14 = vcmp.eq.s32.totalorder %v542_v44, %v4036_v46  ;;  %vm579_vm1 = vcmp.eq.s32.totalorder %v541_v43, %v4038_v47  ;;  %vm583_vm2 = vcmp.eq.s32.totalorder %v542_v44, %v4038_v47 }
 0x11e   : > { %2717 = vmatprep.subr.bf16.mxu1 %v3103_v23  ;;  %2558 = vmatprep.mubr.msk.bf16.mxu1 %vm2557_vm9, %v3559_v49  ;;  %vm2559_vm15 = vmpackc.low %vm577_vm8, %vm573_vm7  ;;  %vm581_vm4 = vcmp.eq.s32.totalorder %v541_v43, %v4040_v48  ;;  %vm585_vm5 = vcmp.eq.s32.totalorder %v542_v44, %v4040_v48  ;;  %vm588_vm6 = vcmp.eq.s32.totalorder %v543_v50, %v4034_v45  ;;  %v799_v43 = vld [vmem:[#allocation2 + $0x20] sm:$0xff] }
 0x11f   : > { %vm2529_vm0 = vmpackc.low %vm584_vm11, %vm580_vm10  ;;  %vm592_vm7 = vcmp.eq.s32.totalorder %v544_v51, %v4034_v45  ;;  %vm590_vm9 = vcmp.eq.s32.totalorder %v543_v50, %v4036_v46  ;;  %vm594_vm10 = vcmp.eq.s32.totalorder %v544_v51, %v4036_v46 }
 0x120   : > { %2654 = vmatpush3.bf16.msra.mxu0 %v3104_v24  ;;  %vm2561_vm3 = vmpackc.low %vm586_vm14, %vm582_vm13  ;;  %vm587_vm13 = vcmp.eq.s32.totalorder %v543_v50, %v4038_v47  ;;  %vm591_vm14 = vcmp.eq.s32.totalorder %v544_v51, %v4038_v47 }
 0x121   : > { %2718 = vmatpush3.bf16.msra.mxu1 %v3105_v25  ;;  %2655 = vmatprep.subr.bf16.mxu0 %v3106_v26  ;;  %vm2531_vm8 = vmpackc.low %vm583_vm2, %vm579_vm1  ;;  %vm593_vm1 = vcmp.eq.s32.totalorder %v544_v51, %v4040_v48  ;;  %vm596_vm2 = vcmp.eq.s32.totalorder %v545_v52, %v4034_v45  ;;  %v797_v25 = vld [vmem:[#allocation2 + $0x10] sm:$0xff] }
 0x122   : > { %2719 = vmatprep.subr.bf16.mxu1 %v3107_v28  ;;  %vm2563_vm11 = vmpackc.low %vm585_vm5, %vm581_vm4  ;;  %vm598_vm5 = vcmp.eq.s32.totalorder %v545_v52, %v4036_v46 }
 0x123   : > { %vm2535_vm4 = vmpackc.low %vm591_vm14, %vm587_vm13  ;;  %vm604_vm13 = vcmp.eq.s32.totalorder %v547_v54, %v4034_v45  ;;  %vm608_vm14 = vcmp.eq.s32.totalorder %v548_v55, %v4034_v45 }
 0x124   : > { %2656 = vmatpush3.bf16.msra.mxu0 %v3108_v29 }
 0x125   : > { %2720 = vmatpush3.bf16.msra.mxu1 %v3109_v30  ;;  %2657 = vmatprep.subr.bf16.mxu0 %v3110_v31  ;;  %v798_v30 = vld [vmem:[#allocation2 + $0x18] sm:$0xff] }
 0x126   : > { %2721 = vmatprep.subr.bf16.mxu1 %v3111_v33 }
 0x128   : > { %2658 = vmatpush3.bf16.msra.mxu0 %v3112_v35 }
 0x129   : > { %2722 = vmatpush3.bf16.msra.mxu1 %v3113_v38 }
 0x12b   : > { %2528 = vmatmul.mubr.msk.bf16.vlgmr.msra.gmra.mrb[0].mxu0 %vm2527_vm12, %v3559_v49  ;;  %vm2533_vm12 = vmpackc.low %vm592_vm7, %vm588_vm6  ;;  %vm602_vm6 = vcmp.eq.s32.totalorder %v546_v53, %v4036_v46 }
 0x12c   : > { %2560 = vmatmul.mubr.msk.bf16.vlgmr.msra.gmra.mrb[0].mxu1 %vm2559_vm15, %v3559_v49  ;;  %2530 = vmatprep.mubr.msk.bf16.mxu0 %vm2529_vm0, %v3559_v49  ;;  %vm2565_vm15 = vmpackc.low %vm594_vm10, %vm590_vm9  ;;  %vm589_vm0 = vcmp.eq.s32.totalorder %v543_v50, %v4040_v48  ;;  %vm595_vm10 = vcmp.eq.s32.totalorder %v545_v52, %v4038_v47 }
 0x12d   : > { %2562 = vmatprep.mubr.msk.bf16.mxu1 %vm2561_vm3, %v3559_v49  ;;  %vm600_vm3 = vcmp.eq.s32.totalorder %v546_v53, %v4034_v45  ;;  %vm2567_vm7 = vmpackc.low %vm593_vm1, %vm589_vm0  ;;  %vm606_vm1 = vcmp.eq.s32.totalorder %v547_v54, %v4036_v46 }
 0x12e   : > { %vm2569_vm9 = vmpackc.low %vm602_vm6, %vm598_vm5  ;;  %vm603_vm6 = vcmp.eq.s32.totalorder %v547_v54, %v4038_v47 }
 0x133   : > { %2532 = vmatmul.mubr.msk.bf16.gmra.mrb[4].mxu0 %vm2531_vm8, %v3559_v49  ;;  %vm2537_vm8 = vmpackc.low %vm600_vm3, %vm596_vm2  ;;  %vm610_vm2 = vcmp.eq.s32.totalorder %v548_v55, %v4036_v46 }
 0x134   : > { %2564 = vmatmul.mubr.msk.bf16.gmra.mrb[4].mxu1 %vm2563_vm11, %v3559_v49  ;;  %2534 = vmatprep.mubr.msk.bf16.mxu0 %vm2533_vm12, %v3559_v49  ;;  %vm599_vm11 = vcmp.eq.s32.totalorder %v546_v53, %v4038_v47  ;;  %vm597_vm12 = vcmp.eq.s32.totalorder %v545_v52, %v4040_v48  ;;  %vm2573_vm5 = vmpackc.low %vm610_vm2, %vm606_vm1  ;;  %vm611_vm2 = vcmp.eq.s32.totalorder %v549_v56, %v4038_v47 }
 0x135   : > { %2566 = vmatprep.mubr.msk.bf16.mxu1 %vm2565_vm15, %v3559_v49  ;;  %vm601_vm15 = vcmp.eq.s32.totalorder %v546_v53, %v4040_v48  ;;  %vm2539_vm0 = vmpackc.low %vm599_vm11, %vm595_vm10  ;;  %vm612_vm10 = vcmp.eq.s32.totalorder %v549_v56, %v4034_v45  ;;  %vm616_vm11 = vcmp.eq.s32.totalorder %v550_v57, %v4034_v45 }
 0x136   : > { %vm2571_vm3 = vmpackc.low %vm601_vm15, %vm597_vm12  ;;  %vm614_vm15 = vcmp.eq.s32.totalorder %v549_v56, %v4036_v46 }
 0x13b   : > { %2536 = vmatmul.mubr.msk.bf16.gmra.mrb[8].mxu0 %vm2535_vm4, %v3559_v49  ;;  %vm2541_vm4 = vmpackc.low %vm608_vm14, %vm604_vm13  ;;  %vm618_vm13 = vcmp.eq.s32.totalorder %v550_v57, %v4036_v46 }
 0x13c   : > { %2568 = vmatmul.mubr.msk.bf16.gmra.mrb[8].mxu1 %vm2567_vm7, %v3559_v49  ;;  %2538 = vmatprep.mubr.msk.bf16.mxu0 %vm2537_vm8, %v3559_v49  ;;  %vm607_vm7 = vcmp.eq.s32.totalorder %v548_v55, %v4038_v47  ;;  %vm605_vm8 = vcmp.eq.s32.totalorder %v547_v54, %v4040_v48  ;;  %vm2577_vm1 = vmpackc.low %vm618_vm13, %vm614_vm15  ;;  %vm619_vm13 = vcmp.eq.s32.totalorder %v551_v58, %v4038_v47 }
 0x13d   : > { %2570 = vmatprep.mubr.msk.bf16.mxu1 %vm2569_vm9, %v3559_v49  ;;  %vm609_vm9 = vcmp.eq.s32.totalorder %v548_v55, %v4040_v48  ;;  %vm2543_vm12 = vmpackc.low %vm607_vm7, %vm603_vm6  ;;  %vm620_vm6 = vcmp.eq.s32.totalorder %v551_v58, %v4034_v45  ;;  %vm624_vm7 = vcmp.eq.s32.totalorder %v552_v59, %v4034_v45 }
 0x13e   : > { %vm2575_vm14 = vmpackc.low %vm609_vm9, %vm605_vm8  ;;  %vm622_vm9 = vcmp.eq.s32.totalorder %v551_v58, %v4036_v46 }
 0x143   : > { %2540 = vmatmul.mubr.msk.bf16.gmra.mrb[12].mxu0 %vm2539_vm0, %v3559_v49  ;;  %vm2545_vm0 = vmpackc.low %vm616_vm11, %vm612_vm10  ;;  %vm626_vm10 = vcmp.eq.s32.totalorder %v552_v59, %v4036_v46 }
 0x144   : > { %2572 = vmatmul.mubr.msk.bf16.gmra.mrb[12].mxu1 %vm2571_vm3, %v3559_v49  ;;  %2542 = vmatprep.mubr.msk.bf16.mxu0 %vm2541_vm4, %v3559_v49  ;;  %vm615_vm3 = vcmp.eq.s32.totalorder %v550_v57, %v4038_v47  ;;  %vm613_vm4 = vcmp.eq.s32.totalorder %v549_v56, %v4040_v48  ;;  %vm2581_vm15 = vmpackc.low %vm626_vm10, %vm622_vm9  ;;  %vm627_vm10 = vcmp.eq.s32.totalorder %v553_v60, %v4038_v47 }
 0x145   : > { %2574 = vmatprep.mubr.msk.bf16.mxu1 %vm2573_vm5, %v3559_v49  ;;  %vm617_vm5 = vcmp.eq.s32.totalorder %v550_v57, %v4040_v48  ;;  %vm2547_vm8 = vmpackc.low %vm615_vm3, %vm611_vm2  ;;  %vm628_vm2 = vcmp.eq.s32.totalorder %v553_v60, %v4034_v45  ;;  %vm632_vm3 = vcmp.eq.s32.totalorder %v554_v61, %v4034_v45 }
 0x146   : > { %vm2579_vm11 = vmpackc.low %vm617_vm5, %vm613_vm4  ;;  %vm630_vm5 = vcmp.eq.s32.totalorder %v553_v60, %v4036_v46 }
 0x14b   : > { %2544 = vmatmul.mubr.msk.bf16.gmra.mrb[16].mxu0 %vm2543_vm12, %v3559_v49  ;;  %vm2549_vm12 = vmpackc.low %vm624_vm7, %vm620_vm6  ;;  %vm634_vm6 = vcmp.eq.s32.totalorder %v554_v61, %v4036_v46 }
 0x14c   : > { %2576 = vmatmul.mubr.msk.bf16.gmra.mrb[16].mxu1 %vm2575_vm14, %v3559_v49  ;;  %2546 = vmatprep.mubr.msk.bf16.mxu0 %vm2545_vm0, %v3559_v49  ;;  %vm623_vm14 = vcmp.eq.s32.totalorder %v552_v59, %v4038_v47  ;;  %vm621_vm0 = vcmp.eq.s32.totalorder %v551_v58, %v4040_v48  ;;  %vm2585_vm9 = vmpackc.low %vm634_vm6, %vm630_vm5 }
 0x14d   : > { %2578 = vmatprep.mubr.msk.bf16.mxu1 %vm2577_vm1, %v3559_v49  ;;  %vm625_vm1 = vcmp.eq.s32.totalorder %v552_v59, %v4040_v48  ;;  %vm2551_vm4 = vmpackc.low %vm623_vm14, %vm619_vm13 }
 0x14e   : > { %vm2583_vm7 = vmpackc.low %vm625_vm1, %vm621_vm0 }
 0x153   : > { %2548 = vmatmul.mubr.msk.bf16.gmra.mrb[20].mxu0 %vm2547_vm8, %v3559_v49  ;;  %vm2553_vm8 = vmpackc.low %vm632_vm3, %vm628_vm2 }
 0x154   : > { %2580 = vmatmul.mubr.msk.bf16.gmra.mrb[20].mxu1 %vm2579_vm11, %v3559_v49  ;;  %2550 = vmatprep.mubr.msk.bf16.mxu0 %vm2549_vm12, %v3559_v49  ;;  %vm631_vm11 = vcmp.eq.s32.totalorder %v554_v61, %v4038_v47  ;;  %vm629_vm12 = vcmp.eq.s32.totalorder %v553_v60, %v4040_v48 }
 0x155   : > { %2582 = vmatprep.mubr.msk.bf16.mxu1 %vm2581_vm15, %v3559_v49  ;;  %vm633_vm15 = vcmp.eq.s32.totalorder %v554_v61, %v4040_v48  ;;  %vm2555_vm13 = vmpackc.low %vm631_vm11, %vm627_vm10  ;;  %v800_v48 = vld [vmem:[#allocation2 + $0x28] sm:$0xff]  ;;  %v801_v61 = vld [vmem:[#allocation2 + $0x30] sm:$0xff] }
 0x156   : > { %vm2587_vm14 = vmpackc.low %vm633_vm15, %vm629_vm12 }
 0x15b   : > { %2552 = vmatmul.mubr.msk.bf16.gmra.mrb[24].mxu0 %vm2551_vm4, %v3559_v49 }
 0x15c   : > { %2584 = vmatmul.mubr.msk.bf16.gmra.mrb[24].mxu1 %vm2583_vm7, %v3559_v49  ;;  %2554 = vmatprep.mubr.msk.bf16.mxu0 %vm2553_vm8, %v3559_v49 }
 0x15d   : > { %2586 = vmatprep.mubr.msk.bf16.mxu1 %vm2585_vm9, %v3559_v49 }
 0x163   : > { %2556 = vmatmul.mubr.msk.bf16.gmra.mrb[28].mxu0 %vm2555_vm13, %v3559_v49 }
 0x164   : > { %2588 = vmatmul.mubr.msk.bf16.gmra.mrb[28].mxu1 %vm2587_vm14, %v3559_v49 }
 0x1fe   : > { %v2659_v62 = vpop.f32.mrb[0].mxu0 }
 0x1ff   : > { %v2723_v63 = vpop.f32.mrb[0].mxu1  ;;  %v2660_v0 = vpop.f32.mrb[1].mxu0 }
 0x200   : > { %v2661_v1 = vadd.f32 %v2660_v0, %v2659_v62  ;;  %v2724_v2 = vpop.f32.mrb[1].mxu1  ;;  %v2662_v3 = vpop.f32.mrb[2].mxu0 }
 0x201   : > { %v2725_v4 = vadd.f32 %v2724_v2, %v2723_v63  ;;  %v2726_v5 = vpop.f32.mrb[2].mxu1  ;;  %v2663_v6 = vpop.f32.mrb[3].mxu0  ;;  %v802_v2 = vld [vmem:[#allocation2 + $0x38] sm:$0xff] }
 0x202   : > { %v2664_v8 = vadd.f32 %v2663_v6, %v2662_v3  ;;  %v2727_v9 = vpop.f32.mrb[3].mxu1 }
 0x203   : > { %v1199_v10 = vadd.f32 %v2725_v4, %v2661_v1  ;;  %v2728_v11 = vadd.f32 %v2727_v9, %v2726_v5 }
 0x205   : > { %v1261_v13 = vadd.f32 %v1199_v10, %v795_v7  ;;  %v1202_v14 = vadd.f32 %v2728_v11, %v2664_v8 }
 0x206   : > { %v2665_v15 = vpop.f32.mrb[4].mxu0 }
 0x207   : > { %1277 = vst [vmem:[#allocation2] sm:$0xff] %v1261_v13  ;;  %v1262_v16 = vadd.f32 %v1202_v14, %v796_v12  ;;  %v2729_v17 = vpop.f32.mrb[4].mxu1  ;;  %v2666_v18 = vpop.f32.mrb[5].mxu0 }
 0x208   : > { %v2667_v19 = vadd.f32 %v2666_v18, %v2665_v15  ;;  %v2730_v20 = vpop.f32.mrb[5].mxu1  ;;  %v2668_v21 = vpop.f32.mrb[6].mxu0  ;;  %v803_v15 = vld [vmem:[#allocation2 + $0x40] sm:$0xff] }
 0x209   : > { %1278 = vst [vmem:[#allocation2 + $0x8] sm:$0xff] %v1262_v16  ;;  %v2731_v22 = vadd.f32 %v2730_v20, %v2729_v17  ;;  %v2732_v23 = vpop.f32.mrb[6].mxu1  ;;  %v2669_v24 = vpop.f32.mrb[7].mxu0  ;;  %v804_v20 = vld [vmem:[#allocation2 + $0x48] sm:$0xff] }
 0x20a   : > { %v2670_v26 = vadd.f32 %v2669_v24, %v2668_v21  ;;  %v2733_v27 = vpop.f32.mrb[7].mxu1 }
 0x20b   : > { %v1207_v28 = vadd.f32 %v2731_v22, %v2667_v19  ;;  %v2734_v29 = vadd.f32 %v2733_v27, %v2732_v23 }
 0x20d   : > { %v1263_v31 = vadd.f32 %v1207_v28, %v797_v25  ;;  %v1210_v32 = vadd.f32 %v2734_v29, %v2670_v26 }
 0x20e   : > { %v2671_v33 = vpop.f32.mrb[8].mxu0 }
 0x20f   : > { %1279 = vst [vmem:[#allocation2 + $0x10] sm:$0xff] %v1263_v31  ;;  %v1264_v34 = vadd.f32 %v1210_v32, %v798_v30  ;;  %v2735_v35 = vpop.f32.mrb[8].mxu1  ;;  %v2672_v36 = vpop.f32.mrb[9].mxu0 }
 0x210   : > { %v2673_v37 = vadd.f32 %v2672_v36, %v2671_v33  ;;  %v2736_v38 = vpop.f32.mrb[9].mxu1  ;;  %v2674_v39 = vpop.f32.mrb[10].mxu0  ;;  %v805_v33 = vld [vmem:[#allocation2 + $0x50] sm:$0xff] }
 0x211   : > { %1280 = vst [vmem:[#allocation2 + $0x18] sm:$0xff] %v1264_v34  ;;  %v2737_v40 = vadd.f32 %v2736_v38, %v2735_v35  ;;  %v2738_v41 = vpop.f32.mrb[10].mxu1  ;;  %v2675_v42 = vpop.f32.mrb[11].mxu0  ;;  %v806_v38 = vld [vmem:[#allocation2 + $0x58] sm:$0xff] }
 0x212   : > { %v2676_v44 = vadd.f32 %v2675_v42, %v2674_v39  ;;  %v2739_v45 = vpop.f32.mrb[11].mxu1 }
 0x213   : > { %v1215_v46 = vadd.f32 %v2737_v40, %v2673_v37  ;;  %v2740_v47 = vadd.f32 %v2739_v45, %v2738_v41 }
 0x215   : > { %v1265_v49 = vadd.f32 %v1215_v46, %v799_v43  ;;  %v1218_v50 = vadd.f32 %v2740_v47, %v2676_v44 }
 0x216   : > { %v2677_v51 = vpop.f32.mrb[12].mxu0 }
 0x217   : > { %1281 = vst [vmem:[#allocation2 + $0x20] sm:$0xff] %v1265_v49  ;;  %v1266_v52 = vadd.f32 %v1218_v50, %v800_v48  ;;  %v2741_v53 = vpop.f32.mrb[12].mxu1  ;;  %v2678_v54 = vpop.f32.mrb[13].mxu0 }
 0x218   : > { %v2679_v55 = vadd.f32 %v2678_v54, %v2677_v51  ;;  %v2742_v56 = vpop.f32.mrb[13].mxu1  ;;  %v2680_v57 = vpop.f32.mrb[14].mxu0  ;;  %v807_v51 = vld [vmem:[#allocation2 + $0x60] sm:$0xff] }
 0x219   : > { %1282 = vst [vmem:[#allocation2 + $0x28] sm:$0xff] %v1266_v52  ;;  %v2743_v58 = vadd.f32 %v2742_v56, %v2741_v53  ;;  %v2744_v59 = vpop.f32.mrb[14].mxu1  ;;  %v2681_v60 = vpop.f32.mrb[15].mxu0  ;;  %v808_v56 = vld [vmem:[#allocation2 + $0x68] sm:$0xff] }
 0x21a   : > { %v2682_v62 = vadd.f32 %v2681_v60, %v2680_v57  ;;  %v2745_v63 = vpop.f32.mrb[15].mxu1 }
 0x21b   : > { %v1223_v0 = vadd.f32 %v2743_v58, %v2679_v55  ;;  %v2746_v1 = vadd.f32 %v2745_v63, %v2744_v59 }
 0x21d   : > { %v1267_v3 = vadd.f32 %v1223_v0, %v801_v61  ;;  %v1226_v4 = vadd.f32 %v2746_v1, %v2682_v62 }
 0x21e   : > { %v2683_v5 = vpop.f32.mrb[16].mxu0 }
 0x21f   : > { %1283 = vst [vmem:[#allocation2 + $0x30] sm:$0xff] %v1267_v3  ;;  %v1268_v6 = vadd.f32 %v1226_v4, %v802_v2  ;;  %v2747_v7 = vpop.f32.mrb[16].mxu1  ;;  %v2684_v8 = vpop.f32.mrb[17].mxu0 }
 0x220   : > { %v2685_v9 = vadd.f32 %v2684_v8, %v2683_v5  ;;  %v2748_v10 = vpop.f32.mrb[17].mxu1  ;;  %v2686_v11 = vpop.f32.mrb[18].mxu0  ;;  %v809_v5 = vld [vmem:[#allocation2 + $0x70] sm:$0xff] }
 0x221   : > { %1284 = vst [vmem:[#allocation2 + $0x38] sm:$0xff] %v1268_v6  ;;  %v2749_v12 = vadd.f32 %v2748_v10, %v2747_v7  ;;  %v2750_v13 = vpop.f32.mrb[18].mxu1  ;;  %v2687_v14 = vpop.f32.mrb[19].mxu0  ;;  %v810_v10 = vld [vmem:[#allocation2 + $0x78] sm:$0xff] }
 0x222   : > { %v2688_v16 = vadd.f32 %v2687_v14, %v2686_v11  ;;  %v2751_v17 = vpop.f32.mrb[19].mxu1  ;;  %v3114_v14 = vld [vmem:[#allocation11] sm:$0xff] (!%p2589_p7)  }
 0x223   : > { %v1231_v18 = vadd.f32 %v2749_v12, %v2685_v9  ;;  %v2752_v19 = vadd.f32 %v2751_v17, %v2750_v13  ;;  %2819 = vmatprep.subr.bf16.mxu0 (!%p2589_p7), %v3114_v14  ;;  %v3117_v17 = vld [vmem:[#allocation11 + $0x18] sm:$0xff] (!%p2589_p7)  }
 0x224   : > { %2820 = vmatpush3.bf16.msra.mxu0 (!%p2589_p7), %v3114_v14  ;;  %v3130_v14 = vld [vmem:[#allocation12] sm:$0xff] (!%p2589_p7)  }
 0x225   : > { %v1269_v21 = vadd.f32 %v1231_v18, %v803_v15  ;;  %v1234_v22 = vadd.f32 %v2752_v19, %v2688_v16  ;;  %v3115_v15 = vld [vmem:[#allocation11 + $0x8] sm:$0xff] (!%p2589_p7)   ;;  %v3116_v16 = vld [vmem:[#allocation11 + $0x10] sm:$0xff] (!%p2589_p7)   ;;  %v1337_v18 = vld [vmem:[#allocation2] sm:$0xff] (!%p2589_p7)  ;;  %2883 = vmatprep.subr.bf16.mxu1 (!%p2589_p7), %v3130_v14 }
 0x226   : > { %v2689_v23 = vpop.f32.mrb[20].mxu0  ;;  %2821 = vmatprep.subr.bf16.mxu0 (!%p2589_p7), %v3115_v15  ;;  %v1338_v19 = vld [vmem:[#allocation2 + $0x8] sm:$0xff] (!%p2589_p7)  ;;  %2884 = vmatpush3.bf16.msra.mxu1 (!%p2589_p7), %v3130_v14 }
 0x227   : > { %1285 = vst [vmem:[#allocation2 + $0x40] sm:$0xff] %v1269_v21  ;;  %v1270_v24 = vadd.f32 %v1234_v22, %v804_v20  ;;  %v2753_v25 = vpop.f32.mrb[20].mxu1  ;;  %v2690_v26 = vpop.f32.mrb[21].mxu0  ;;  %v1353_v20 = vpack.c.bf16 (!%p2589_p7), %v1338_v19, %v1337_v18  ;;  %v3118_v21 = vld [vmem:[#allocation11 + $0x20] sm:$0xff] (!%p2589_p7)   ;;  %v3119_v22 = vld [vmem:[#allocation11 + $0x28] sm:$0xff] (!%p2589_p7)  }
 0x228   : > { %v2691_v27 = vadd.f32 %v2690_v26, %v2689_v23  ;;  %v2754_v28 = vpop.f32.mrb[21].mxu1  ;;  %v2692_v29 = vpop.f32.mrb[22].mxu0  ;;  %2822 = vmatpush3.bf16.msra.mxu0 (!%p2589_p7), %v3115_v15  ;;  %v3120_v23 = vld [vmem:[#allocation11 + $0x30] sm:$0xff] (!%p2589_p7)   ;;  %v3131_v15 = vld [vmem:[#allocation12 + $0x8] sm:$0xff] (!%p2589_p7)   ;;  %v3134_v18 = vld [vmem:[#allocation12 + $0x20] sm:$0xff] (!%p2589_p7)  }
 0x229   : > { %1286 = vst [vmem:[#allocation2 + $0x48] sm:$0xff] %v1270_v24  ;;  %v2755_v30 = vadd.f32 %v2754_v28, %v2753_v25  ;;  %v2756_v31 = vpop.f32.mrb[22].mxu1  ;;  %v2693_v32 = vpop.f32.mrb[23].mxu0  ;;  %2823 = vmatprep.subr.bf16.mxu0 (!%p2589_p7), %v3116_v16  ;;  %2835 = vmatprep.mubr.bf16.mxu0 (!%p2589_p7), %v1353_v20  ;;  %v3121_v24 = vld [vmem:[#allocation11 + $0x38] sm:$0xff] (!%p2589_p7)   ;;  %v1339_v25 = vld [vmem:[#allocation2 + $0x10] sm:$0xff] (!%p2589_p7)  ;;  %v1340_v26 = vld [vmem:[#allocation2 + $0x18] sm:$0xff] (!%p2589_p7) }
 0x22a   : > { %v2694_v34 = vadd.f32 %v2693_v32, %v2692_v29  ;;  %v2757_v35 = vpop.f32.mrb[23].mxu1  ;;  %v1341_v28 = vld [vmem:[#allocation2 + $0x20] sm:$0xff] (!%p2589_p7)  ;;  %v1342_v29 = vld [vmem:[#allocation2 + $0x28] sm:$0xff] (!%p2589_p7)  ;;  %v3123_v32 = vld [vmem:[#allocation9 + $0x8] sm:$0xff] (!%p2589_p7)   ;;  %2885 = vmatprep.subr.bf16.mxu1 (!%p2589_p7), %v3131_v15 }
 0x22b   : > { %v1239_v36 = vadd.f32 %v2755_v30, %v2691_v27  ;;  %v2758_v37 = vadd.f32 %v2757_v35, %v2756_v31  ;;  %v3122_v27 = vld [vmem:[#allocation9] sm:$0xff] (!%p2589_p7)   ;;  %v1354_v30 = vpack.c.bf16 (!%p2589_p7), %v1340_v26, %v1339_v25  ;;  %v1355_v31 = vpack.c.bf16 (!%p2589_p7), %v1342_v29, %v1341_v28  ;;  %v3124_v35 = vld [vmem:[#allocation9 + $0x10] sm:$0xff] (!%p2589_p7)   ;;  %2886 = vmatpush3.bf16.msra.mxu1 (!%p2589_p7), %v3131_v15  ;;  %v3135_v19 = vld [vmem:[#allocation12 + $0x28] sm:$0xff] (!%p2589_p7)  }
 0x22c   : > { %2824 = vmatpush3.bf16.msra.mxu0 (!%p2589_p7), %v3116_v16  ;;  %v3132_v16 = vld [vmem:[#allocation12 + $0x10] sm:$0xff] (!%p2589_p7)  }
 0x22d   : > { %v1271_v39 = vadd.f32 %v1239_v36, %v805_v33  ;;  %v1242_v40 = vadd.f32 %v2758_v37, %v2694_v34  ;;  %2825 = vmatprep.subr.bf16.mxu0 (!%p2589_p7), %v3117_v17  ;;  %v1343_v33 = vld [vmem:[#allocation2 + $0x30] sm:$0xff] (!%p2589_p7)  ;;  %v1344_v34 = vld [vmem:[#allocation2 + $0x38] sm:$0xff] (!%p2589_p7)  ;;  %2887 = vmatprep.subr.bf16.mxu1 (!%p2589_p7), %v3132_v16 }
 0x22e   : > { %v2695_v41 = vpop.f32.mrb[24].mxu0  ;;  %v1345_v36 = vld [vmem:[#allocation2 + $0x40] sm:$0xff] (!%p2589_p7)  ;;  %v3136_v20 = vld [vmem:[#allocation12 + $0x30] sm:$0xff] (!%p2589_p7)  }
 0x22f   : > { %1287 = vst [vmem:[#allocation2 + $0x50] sm:$0xff] %v1271_v39  ;;  %v1272_v42 = vadd.f32 %v1242_v40, %v806_v38  ;;  %v2759_v43 = vpop.f32.mrb[24].mxu1  ;;  %v2696_v44 = vpop.f32.mrb[25].mxu0  ;;  %v1356_v38 = vpack.c.bf16 (!%p2589_p7), %v1344_v34, %v1343_v33  ;;  %v3125_v40 = vld [vmem:[#allocation9 + $0x18] sm:$0xff] (!%p2589_p7)   ;;  %2888 = vmatpush3.bf16.msra.mxu1 (!%p2589_p7), %v3132_v16 }
 0x230   : > { %v2697_v45 = vadd.f32 %v2696_v44, %v2695_v41  ;;  %v2760_v46 = vpop.f32.mrb[25].mxu1  ;;  %v2698_v47 = vpop.f32.mrb[26].mxu0  ;;  %2826 = vmatpush3.bf16.msra.mxu0 (!%p2589_p7), %v3117_v17  ;;  %v1346_v37 = vld [vmem:[#allocation2 + $0x48] sm:$0xff] (!%p2589_p7)  ;;  %v3133_v17 = vld [vmem:[#allocation12 + $0x18] sm:$0xff] (!%p2589_p7)  }
 0x231   : > { %1288 = vst [vmem:[#allocation2 + $0x58] sm:$0xff] %v1272_v42  ;;  %v2761_v48 = vadd.f32 %v2760_v46, %v2759_v43  ;;  %v2762_v49 = vpop.f32.mrb[26].mxu1  ;;  %v2699_v50 = vpop.f32.mrb[27].mxu0  ;;  %2827 = vmatprep.subr.bf16.mxu0 (!%p2589_p7), %v3118_v21  ;;  %v1357_v39 = vpack.c.bf16 (!%p2589_p7), %v1346_v37, %v1345_v36  ;;  %v3126_v43 = vld [vmem:[#allocation9 + $0x20] sm:$0xff] (!%p2589_p7)   ;;  %2889 = vmatprep.subr.bf16.mxu1 (!%p2589_p7), %v3133_v17 }
 0x232   : > { %v2700_v52 = vadd.f32 %v2699_v50, %v2698_v47  ;;  %v2763_v53 = vpop.f32.mrb[27].mxu1 }
 0x233   : > { %v1247_v54 = vadd.f32 %v2761_v48, %v2697_v45  ;;  %v2764_v55 = vadd.f32 %v2763_v53, %v2762_v49  ;;  %v3127_v48 = vld [vmem:[#allocation9 + $0x28] sm:$0xff] (!%p2589_p7)   ;;  %2890 = vmatpush3.bf16.msra.mxu1 (!%p2589_p7), %v3133_v17 }
 0x234   : > { %2828 = vmatpush3.bf16.msra.mxu0 (!%p2589_p7), %v3118_v21  ;;  %v4159_v53 = vld [vmem:[%s3968_s28 + $0x8] sm:$0xff] (!%p2589_p7)  ;;  %2891 = vmatprep.subr.bf16.mxu1 (!%p2589_p7), %v3134_v18  ;;  %v3137_v21 = vld [vmem:[#allocation12 + $0x38] sm:$0xff] (!%p2589_p7)  }
 0x235   : > { %v1273_v57 = vadd.f32 %v1247_v54, %v807_v51  ;;  %v1250_v58 = vadd.f32 %v2764_v55, %v2700_v52  ;;  %2829 = vmatprep.subr.bf16.mxu0 (!%p2589_p7), %v3119_v22  ;;  %v3128_v51 = vld [vmem:[#allocation9 + $0x30] sm:$0xff] (!%p2589_p7)   ;;  %v4156_v52 = vld [vmem:[%s3968_s28] sm:$0xff] (!%p2589_p7) }
 0x236   : > { %v2701_v59 = vpop.f32.mrb[28].mxu0  ;;  %v1347_v41 = vld [vmem:[#allocation2 + $0x50] sm:$0xff] (!%p2589_p7)  ;;  %v1313_v55 = vpack.c.bf16 (!%p2589_p7), %v4159_v53, %v4156_v52 }
 0x237   : > { %1289 = vst [vmem:[#allocation2 + $0x60] sm:$0xff] %v1273_v57  ;;  %v1274_v60 = vadd.f32 %v1250_v58, %v808_v56  ;;  %v2765_v61 = vpop.f32.mrb[28].mxu1  ;;  %v2702_v62 = vpop.f32.mrb[29].mxu0  ;;  %v3129_v56 = vld [vmem:[#allocation9 + $0x38] sm:$0xff] (!%p2589_p7)   ;;  %v4164_v57 = vld [vmem:[%s3968_s28 + $0x10] sm:$0xff] (!%p2589_p7)  ;;  %2892 = vmatpush3.bf16.msra.mxu1 (!%p2589_p7), %v3134_v18 }
 0x238   : > { %v2703_v63 = vadd.f32 %v2702_v62, %v2701_v59  ;;  %v2766_v0 = vpop.f32.mrb[29].mxu1  ;;  %v2704_v1 = vpop.f32.mrb[30].mxu0  ;;  %2830 = vmatpush3.bf16.msra.mxu0 (!%p2589_p7), %v3119_v22  ;;  %v1348_v42 = vld [vmem:[#allocation2 + $0x58] sm:$0xff] (!%p2589_p7)  ;;  %v4167_v58 = vld [vmem:[%s3968_s28 + $0x18] sm:$0xff] (!%p2589_p7)  ;;  %v4170_v59 = vld [vmem:[%s3968_s28 + $0x20] sm:$0xff] (!%p2589_p7)  ;;  %2893 = vmatprep.subr.bf16.mxu1 (!%p2589_p7), %v3135_v19 }
 0x239   : > { %1290 = vst [vmem:[#allocation2 + $0x68] sm:$0xff] %v1274_v60  ;;  %v2767_v2 = vadd.f32 %v2766_v0, %v2765_v61  ;;  %v2768_v3 = vpop.f32.mrb[30].mxu1  ;;  %v2705_v4 = vpop.f32.mrb[31].mxu0  ;;  %2831 = vmatprep.subr.bf16.mxu0 (!%p2589_p7), %v3120_v23  ;;  %v1358_v46 = vpack.c.bf16 (!%p2589_p7), %v1348_v42, %v1347_v41  ;;  %v4173_v60 = vld [vmem:[%s3968_s28 + $0x28] sm:$0xff] (!%p2589_p7)  ;;  %v1314_v61 = vpack.c.bf16 (!%p2589_p7), %v4167_v58, %v4164_v57  ;;  %v4183_v0 = vld [vmem:[%s3968_s28 + $0x38] sm:$0xff] (!%p2589_p7) }
 0x23a   : > { %v2706_v6 = vadd.f32 %v2705_v4, %v2704_v1  ;;  %v2769_v7 = vpop.f32.mrb[31].mxu1  ;;  %v1315_v62 = vpack.c.bf16 (!%p2589_p7), %v4173_v60, %v4170_v59  ;;  %v4186_v1 = vld [vmem:[%s3968_s28 + $0x40] sm:$0xff] (!%p2589_p7)  ;;  %v4222_v22 = vld [vmem:[%s4651_s16] ss:$0 sm:$0xff] (!%p2589_p7) }
 0x23b   : > { %v1255_v8 = vadd.f32 %v2767_v2, %v2703_v63  ;;  %v2770_v9 = vadd.f32 %v2769_v7, %v2768_v3  ;;  %1296 = sbr.rel (%p2589_p7) target bundleno = 1419 (0x58b), region = 92  ;;  %v4180_v63 = vld [vmem:[%s3968_s28 + $0x30] sm:$0xff] (!%p2589_p7)  ;;  %v4189_v2 = vld [vmem:[%s3968_s28 + $0x48] sm:$0xff] (!%p2589_p7)  ;;  %v4202_v7 = vld [vmem:[%s3968_s28 + $0x60] sm:$0xff] (!%p2589_p7)  ;;  %2894 = vmatpush3.bf16.msra.mxu1 (!%p2589_p7), %v3135_v19 }
 0x23c   : > { %2832 = vmatpush3.bf16.msra.mxu0 (!%p2589_p7), %v3120_v23  ;;  %v1316_v3 = vpack.c.bf16 (!%p2589_p7), %v4183_v0, %v4180_v63  ;;  %v1317_v4 = vpack.c.bf16 (!%p2589_p7), %v4189_v2, %v4186_v1  ;;  %2895 = vmatprep.subr.bf16.mxu1 (!%p2589_p7), %v3136_v20 }
 0x23d   : > { %v1275_v11 = vadd.f32 %v1255_v8, %v809_v5  ;;  %v1258_v12 = vadd.f32 %v2770_v9, %v2706_v6  ;;  %2833 = vmatprep.subr.bf16.mxu0 (!%p2589_p7), %v3121_v24  ;;  %v4196_v5 = vld [vmem:[%s3968_s28 + $0x50] sm:$0xff] (!%p2589_p7)  ;;  %v4199_v6 = vld [vmem:[%s3968_s28 + $0x58] sm:$0xff] (!%p2589_p7)  ;;  %v4205_v8 = vld [vmem:[%s3968_s28 + $0x68] sm:$0xff] (!%p2589_p7) }
 0x23e   : > { %v1349_v44 = vld [vmem:[#allocation2 + $0x60] sm:$0xff] (!%p2589_p7)  ;;  %v1318_v9 = vpack.c.bf16 (!%p2589_p7), %v4199_v6, %v4196_v5 }
 0x23f   : > { %1291 = vst [vmem:[#allocation2 + $0x70] sm:$0xff] %v1275_v11  ;;  %v1276_v13 = vadd.f32 %v1258_v12, %v810_v10  ;;  %v1319_v10 = vpack.c.bf16 (!%p2589_p7), %v4205_v8, %v4202_v7  ;;  %v4212_v11 = vld [vmem:[%s3968_s28 + $0x70] sm:$0xff] (!%p2589_p7)  ;;  %v4215_v12 = vld [vmem:[%s3968_s28 + $0x78] sm:$0xff] (!%p2589_p7)  ;;  %2896 = vmatpush3.bf16.msra.mxu1 (!%p2589_p7), %v3136_v20 }
 0x240   : > { %2834 = vmatpush3.bf16.msra.mxu0 (!%p2589_p7), %v3121_v24  ;;  %v1350_v45 = vld [vmem:[#allocation2 + $0x68] sm:$0xff] (!%p2589_p7)  ;;  %2897 = vmatprep.subr.bf16.mxu1 (!%p2589_p7), %v3137_v21 }
 0x241   : > { %1292 = vst [vmem:[#allocation2 + $0x78] sm:$0xff] %v1276_v13  ;;  %2851 = vmatprep.subr.bf16.mxu0 (!%p2589_p7), %v3122_v27  ;;  %v1359_v47 = vpack.c.bf16 (!%p2589_p7), %v1350_v45, %v1349_v44  ;;  %v1320_v13 = vpack.c.bf16 (!%p2589_p7), %v4215_v12, %v4212_v11 }
 0x243   : > { %2836 = vmatmul.mubr.bf16.vlgmr.msra.gmra.mrb[0].mxu0 %v1354_v30  ;;  %2898 = vmatpush3.bf16.msra.mxu1 %v3137_v21 }
 0x244   : > { %2852 = vmatpush3.bf16.msra.mxu0 %v3122_v27  ;;  %2839 = vmatprep.mubr.bf16.mxu0 %v1355_v31 }
 0x245   : > { %2853 = vmatprep.subr.bf16.mxu0 %v3123_v32 }
 0x246   : > { %v1351_v49 = vld [vmem:[#allocation2 + $0x70] sm:$0xff] }
 0x248   : > { %2854 = vmatpush3.bf16.msra.mxu0 %v3123_v32  ;;  %v1352_v50 = vld [vmem:[#allocation2 + $0x78] sm:$0xff] }
 0x249   : > { %2855 = vmatprep.subr.bf16.mxu0 %v3124_v35  ;;  %v1360_v54 = vpack.c.bf16 %v1352_v50, %v1351_v49 }
 0x24b   : > { %2840 = vmatmul.mubr.bf16.gmra.mrb[4].mxu0 %v1356_v38 }
 0x24c   : > { %2856 = vmatpush3.bf16.msra.mxu0 %v3124_v35  ;;  %2843 = vmatprep.mubr.bf16.mxu0 %v1357_v39 }
 0x24d   : > { %2857 = vmatprep.subr.bf16.mxu0 %v3125_v40 }
 0x250   : > { %2858 = vmatpush3.bf16.msra.mxu0 %v3125_v40 }
 0x251   : > { %2859 = vmatprep.subr.bf16.mxu0 %v3126_v43 }
 0x253   : > { %2844 = vmatmul.mubr.bf16.gmra.mrb[8].mxu0 %v1358_v46 }
 0x254   : > { %2860 = vmatpush3.bf16.msra.mxu0 %v3126_v43  ;;  %2847 = vmatprep.mubr.bf16.mxu0 %v1359_v47 }
 0x255   : > { %2861 = vmatprep.subr.bf16.mxu0 %v3127_v48 }
 0x258   : > { %2862 = vmatpush3.bf16.msra.mxu0 %v3127_v48 }
 0x259   : > { %2863 = vmatprep.subr.bf16.mxu0 %v3128_v51 }
 0x25b   : > { %2848 = vmatmul.mubr.bf16.gmra.mrb[12].mxu0 %v1360_v54 }
 0x25c   : > { %2864 = vmatpush3.bf16.msra.mxu0 %v3128_v51  ;;  %2867 = vmatprep.mubr.bf16.mxu0 %v1313_v55 }
 0x25d   : > { %2865 = vmatprep.subr.bf16.mxu0 %v3129_v56 }
 0x260   : > { %2866 = vmatpush3.bf16.msra.mxu0 %v3129_v56 }
 0x263   : > { %2868 = vmatmul.mubr.bf16.vlgmr.msra.gmra.mrb[0].mxu0 %v1314_v61 }
 0x264   : > { %2871 = vmatprep.mubr.bf16.mxu0 %v1315_v62 }
 0x26b   : > { %2872 = vmatmul.mubr.bf16.gmra.mrb[4].mxu0 %v1316_v3 }
 0x26c   : > { %2875 = vmatprep.mubr.bf16.mxu0 %v1317_v4 }
 0x273   : > { %2876 = vmatmul.mubr.bf16.gmra.mrb[8].mxu0 %v1318_v9 }
 0x274   : > { %2879 = vmatprep.mubr.bf16.mxu0 %v1319_v10 }
 0x27b   : > { %2880 = vmatmul.mubr.bf16.gmra.mrb[12].mxu0 %v1320_v13 }
 0x336   : > { %v2869_v23 = vpop.f32.mrb[0].mxu0 }
 0x337   : > { %v4225_v24 = vadd.f32 %v2869_v23, %v4222_v22  ;;  %v1604_v25 = vpop.f32.mrb[1].mxu0 }
 0x338   : > { %v4228_v26 = vadd.f32 %v4222_v22, %v1604_v25  ;;  %v2870_v27 = vpop.f32.mrb[2].mxu0 }
 0x339   : > { %v2609_v28 = vmul.f32 -1.442695, %v4225_v24  ;;  %v4232_v29 = vadd.f32 %v2870_v27, %v4222_v22  ;;  %v1607_v30 = vpop.f32.mrb[3].mxu0 }
 0x33a   : > { %v2607_v31 = vmul.f32 -1.442695, %v4228_v26  ;;  %v4236_v32 = vadd.f32 %v4222_v22, %v1607_v30 }
 0x33b   : > { %3138 = vpow2.f32 %v2609_v28  ;;  %v2610_v33 = vmul.f32 -1.442695, %v4232_v29 }
 0x33c   : > { %3140 = vpow2.f32 %v2607_v31  ;;  %v2608_v34 = vmul.f32 -1.442695, %v4236_v32 }
 0x33d   : > { %3142 = vpow2.f32 %v2610_v33 }
 0x33e   : > { %3144 = vpow2.f32 %v2608_v34  ;;  %v2873_v35 = vpop.f32.mrb[4].mxu0 }
 0x33f   : > { %v4241_v36 = vadd.f32 %v2873_v35, %v4222_v22  ;;  %v1620_v37 = vpop.f32.mrb[5].mxu0 }
 0x340   : > { %v4244_v38 = vadd.f32 %v4222_v22, %v1620_v37  ;;  %v2874_v39 = vpop.f32.mrb[6].mxu0 }
 0x341   : > { %v2613_v40 = vmul.f32 -1.442695, %v4241_v36  ;;  %v4248_v41 = vadd.f32 %v2874_v39, %v4222_v22  ;;  %v1623_v42 = vpop.f32.mrb[7].mxu0 }
 0x342   : > { %v2611_v43 = vmul.f32 -1.442695, %v4244_v38  ;;  %v4252_v44 = vadd.f32 %v4222_v22, %v1623_v42 }
 0x343   : > { %3146 = vpow2.f32 %v2613_v40  ;;  %v2614_v45 = vmul.f32 -1.442695, %v4248_v41 }
 0x344   : > { %3148 = vpow2.f32 %v2611_v43  ;;  %v2612_v46 = vmul.f32 -1.442695, %v4252_v44 }
 0x345   : > { %v3139_v47 = vpop.eup %3138  ;;  %3150 = vpow2.f32 %v2614_v45 }
 0x346   : > { %v3141_v48 = vpop.eup %3140  ;;  %v1740_v49 = vadd.f32 1.0, %v3139_v47  ;;  %3152 = vpow2.f32 %v2612_v46  ;;  %v2877_v50 = vpop.f32.mrb[8].mxu0 }
 0x347   : > { %v3143_v51 = vpop.eup %3142  ;;  %v1738_v54 = vadd.f32 1.0, %v3141_v48  ;;  %v4257_v55 = vadd.f32 %v2877_v50, %v4222_v22  ;;  %v1636_v56 = vpop.f32.mrb[9].mxu0 }
 0x348   : > { %v3145_v61 = vpop.eup %3144  ;;  %3154 = vrcp.f32 %v1740_v49  ;;  %v1741_v62 = vadd.f32 1.0, %v3143_v51  ;;  %v4260_v3 = vadd.f32 %v4222_v22, %v1636_v56  ;;  %v2878_v4 = vpop.f32.mrb[10].mxu0 }
 0x349   : > { %3156 = vrcp.f32 %v1738_v54  ;;  %v1739_v9 = vadd.f32 1.0, %v3145_v61  ;;  %v2617_v10 = vmul.f32 -1.442695, %v4257_v55  ;;  %v4264_v13 = vadd.f32 %v2878_v4, %v4222_v22  ;;  %v1639_v14 = vpop.f32.mrb[11].mxu0 }
 0x34a   : > { %3158 = vrcp.f32 %v1741_v62  ;;  %v2615_v15 = vmul.f32 -1.442695, %v4260_v3  ;;  %v4268_v16 = vadd.f32 %v4222_v22, %v1639_v14 }
 0x34b   : > { %3160 = vrcp.f32 %v1739_v9  ;;  %v2618_v17 = vmul.f32 -1.442695, %v4264_v13 }
 0x34c   : > { %3162 = vpow2.f32 %v2617_v10  ;;  %v2616_v18 = vmul.f32 -1.442695, %v4268_v16 }
 0x34d   : > { %v3147_v19 = vpop.eup %3146  ;;  %3164 = vpow2.f32 %v2615_v15 }
 0x34e   : > { %v3149_v20 = vpop.eup %3148  ;;  %v1744_v21 = vadd.f32 1.0, %v3147_v19  ;;  %3166 = vpow2.f32 %v2618_v17  ;;  %v2881_v23 = vpop.f32.mrb[12].mxu0 }
 0x34f   : > { %v3151_v25 = vpop.eup %3150  ;;  %v1742_v27 = vadd.f32 1.0, %v3149_v20  ;;  %3168 = vpow2.f32 %v2616_v18  ;;  %v4273_v28 = vadd.f32 %v2881_v23, %v4222_v22  ;;  %v1652_v30 = vpop.f32.mrb[13].mxu0 }
 0x350   : > { %v3153_v31 = vpop.eup %3152  ;;  %3170 = vrcp.f32 %v1744_v21  ;;  %v1745_v33 = vadd.f32 1.0, %v3151_v25  ;;  %v4276_v34 = vadd.f32 %v4222_v22, %v1652_v30  ;;  %v2882_v35 = vpop.f32.mrb[14].mxu0 }
 0x351   : > { %3172 = vrcp.f32 %v1742_v27  ;;  %v1743_v37 = vadd.f32 1.0, %v3153_v31  ;;  %v2621_v39 = vmul.f32 -1.442695, %v4273_v28  ;;  %v4280_v40 = vadd.f32 %v2882_v35, %v4222_v22  ;;  %v1655_v42 = vpop.f32.mrb[15].mxu0 }
 0x352   : > { %v3155_v43 = vpop.eup %3154  ;;  %3174 = vrcp.f32 %v1745_v33  ;;  %v2619_v45 = vmul.f32 -1.442695, %v4276_v34  ;;  %v4284_v46 = vadd.f32 %v4222_v22, %v1655_v42 }
 0x353   : > { %v3157_v47 = vpop.eup %3156  ;;  %3176 = vrcp.f32 %v1743_v37  ;;  %v2622_v48 = vmul.f32 -1.442695, %v4280_v40  ;;  %v1788_v54 = vmul.f32 %v3155_v43, %v4225_v24 }
 0x354   : > { %v3159_v49 = vpop.eup %3158  ;;  %3178 = vpow2.f32 %v2621_v39  ;;  %v2620_v50 = vmul.f32 -1.442695, %v4284_v46  ;;  %v1786_v62 = vmul.f32 %v3157_v47, %v4228_v26 }
 0x355   : > { %v3161_v51 = vpop.eup %3160  ;;  %v1789_v56 = vmul.f32 %v3159_v49, %v4232_v29  ;;  %3180 = vpow2.f32 %v2619_v45 }
 0x356   : > { %v3163_v61 = vpop.eup %3162  ;;  %3182 = vpow2.f32 %v2622_v48  ;;  %v1787_v22 = vmul.f32 %v3161_v51, %v4236_v32 }
 0x357   : > { %v3165_v4 = vpop.eup %3164  ;;  %v1748_v9 = vadd.f32 1.0, %v3163_v61  ;;  %3184 = vpow2.f32 %v2620_v50  ;;  %v1803_v10 = vpack.c.bf16 %v1789_v56, %v1788_v54 }
 0x358   : > { %v3167_v14 = vpop.eup %3166  ;;  %v1746_v15 = vadd.f32 1.0, %v3165_v4  ;;  %v1802_v17 = vpack.c.bf16 %v1787_v22, %v1786_v62 }
 0x359   : > { %v3169_v18 = vpop.eup %3168  ;;  %3186 = vrcp.f32 %v1748_v9  ;;  %v1749_v19 = vadd.f32 1.0, %v3167_v14 }
 0x35a   : > { %v3171_v24 = vpop.eup %3170  ;;  %3188 = vrcp.f32 %v1746_v15  ;;  %v1747_v29 = vadd.f32 1.0, %v3169_v18  ;;  %2899 = vmatprep.mubr.bf16.mxu1 %v1802_v17 }
 0x35b   : > { %v3173_v20 = vpop.eup %3172  ;;  %3190 = vrcp.f32 %v1749_v19  ;;  %2900 = vmatmul.mubr.bf16.vlgmr.msra.gmra.mrb[0].mxu1 %v1803_v10  ;;  %v1792_v21 = vmul.f32 %v3171_v24, %v4241_v36 }
 0x35c   : > { %v3175_v26 = vpop.eup %3174  ;;  %3192 = vrcp.f32 %v1747_v29  ;;  %v1790_v27 = vmul.f32 %v3173_v20, %v4244_v38 }
 0x35d   : > { %v3177_v32 = vpop.eup %3176  ;;  %v1793_v23 = vmul.f32 %v3175_v26, %v4248_v41 }
 0x35e   : > { %v3179_v25 = vpop.eup %3178  ;;  %v1791_v30 = vmul.f32 %v3177_v32, %v4252_v44 }
 0x35f   : > { %v3181_v31 = vpop.eup %3180  ;;  %v1752_v33 = vadd.f32 1.0, %v3179_v25  ;;  %v1805_v35 = vpack.c.bf16 %v1793_v23, %v1792_v21 }
 0x360   : > { %v3183_v37 = vpop.eup %3182  ;;  %v1750_v39 = vadd.f32 1.0, %v3181_v31  ;;  %v1804_v42 = vpack.c.bf16 %v1791_v30, %v1790_v27 }
 0x361   : > { %v3185_v43 = vpop.eup %3184  ;;  %3194 = vrcp.f32 %v1752_v33  ;;  %v1753_v45 = vadd.f32 1.0, %v3183_v37 }
 0x362   : > { %3196 = vrcp.f32 %v1750_v39  ;;  %v1751_v47 = vadd.f32 1.0, %v3185_v43  ;;  %2903 = vmatprep.mubr.bf16.mxu1 %v1804_v42 }
 0x363   : > { %v3187_v36 = vpop.eup %3186  ;;  %3198 = vrcp.f32 %v1753_v45  ;;  %2904 = vmatmul.mubr.bf16.gmra.mrb[4].mxu1 %v1805_v35 }
 0x364   : > { %v3189_v41 = vpop.eup %3188  ;;  %3200 = vrcp.f32 %v1751_v47  ;;  %v1796_v44 = vmul.f32 %v3187_v36, %v4257_v55 }
 0x365   : > { %v3191_v38 = vpop.eup %3190  ;;  %v1794_v50 = vmul.f32 %v3189_v41, %v4260_v3 }
 0x366   : > { %v3193_v48 = vpop.eup %3192  ;;  %v1797_v49 = vmul.f32 %v3191_v38, %v4264_v13 }
 0x367   : > { %v1795_v51 = vmul.f32 %v3193_v48, %v4268_v16  ;;  %v2623_v16 = vld [vmem:[%s4652_s29] ss:$0 sm:$0xff] }
 0x368   : > { %v1807_v54 = vpack.c.bf16 %v1797_v49, %v1796_v44 }
 0x369   : > { %v1806_v56 = vpack.c.bf16 %v1795_v51, %v1794_v50 }
 0x36b   : > { %v3195_v61 = vpop.eup %3194  ;;  %2907 = vmatprep.mubr.bf16.mxu1 %v1806_v56 }
 0x36c   : > { %v3197_v62 = vpop.eup %3196  ;;  %2908 = vmatmul.mubr.bf16.gmra.mrb[8].mxu1 %v1807_v54  ;;  %v1800_v9 = vmul.f32 %v3195_v61, %v4273_v28 }
 0x36d   : > { %v3199_v22 = vpop.eup %3198  ;;  %v1798_v55 = vmul.f32 %v3197_v62, %v4276_v34 }
 0x36e   : > { %v3201_v4 = vpop.eup %3200  ;;  %v1801_v10 = vmul.f32 %v3199_v22, %v4280_v40 }
 0x36f   : > { %v1799_v13 = vmul.f32 %v3201_v4, %v4284_v46 }
 0x370   : > { %v1809_v14 = vpack.c.bf16 %v1801_v10, %v1800_v9 }
 0x371   : > { %v1808_v3 = vpack.c.bf16 %v1799_v13, %v1798_v55 }
 0x373   : > { %2911 = vmatprep.mubr.bf16.mxu1 %v1808_v3 }
 0x374   : > { %2912 = vmatmul.mubr.bf16.gmra.mrb[12].mxu1 %v1809_v14 }
 0x42e   : > { %v2901_v15 = vpop.f32.mrb[0].mxu1 }
 0x42f   : > { %v1924_v17 = vadd.f32 %v2901_v15, %v2623_v16  ;;  %v1915_v18 = vpop.f32.mrb[1].mxu1 }
 0x430   : > { %v1916_v19 = vadd.f32 %v2623_v16, %v1915_v18  ;;  %v2902_v24 = vpop.f32.mrb[2].mxu1 }
 0x431   : > { %1982 = vadd.xlane.f32.xlu1 %v1924_v17  ;;  %v1918_v28 = vpop.f32.mrb[3].mxu1  ;;  %v1927_v40 = vadd.f32 %v2902_v24, %v2623_v16 }
 0x432   : > { %1978 = vadd.xlane.f32.xlu0 %v1916_v19  ;;  %v1919_v34 = vadd.f32 %v2623_v16, %v1918_v28 }
 0x435   : > { %1984 = vadd.xlane.f32.xlu1 %v1927_v40 }
 0x436   : > { %1980 = vadd.xlane.f32.xlu0 %v1919_v34  ;;  %v2905_v46 = vpop.f32.mrb[4].mxu1 }
 0x437   : > { %v1940_v29 = vadd.f32 %v2905_v46, %v2623_v16  ;;  %v1931_v20 = vpop.f32.mrb[5].mxu1 }
 0x438   : > { %v2906_v26 = vpop.f32.mrb[6].mxu1  ;;  %v1932_v23 = vadd.f32 %v2623_v16, %v1931_v20 }
 0x439   : > { %v1943_v32 = vadd.f32 %v2906_v26, %v2623_v16  ;;  %v1934_v21 = vpop.f32.mrb[7].mxu1 }
 0x43a   : > { %1990 = vadd.xlane.f32.xlu0 %v1940_v29  ;;  %v1935_v25 = vadd.f32 %v2623_v16, %v1934_v21 }
 0x43b   : > { %1992 = vadd.xlane.f32.xlu1 %v1943_v32 }
 0x43e   : > { %1986 = vadd.xlane.f32.xlu0 %v1932_v23 }
 0x43f   : > { %v2909_v27 = vpop.f32.mrb[8].mxu1  ;;  %1988 = vadd.xlane.f32.xlu1 %v1935_v25 }
 0x440   : > { %v4307_v30 = vadd.f32 %v2909_v27, %v2623_v16  ;;  %v1947_v31 = vpop.f32.mrb[9].mxu1 }
 0x441   : > { %v2910_v33 = vpop.f32.mrb[10].mxu1  ;;  %v4312_v39 = vadd.f32 %v2623_v16, %v1947_v31 }
 0x442   : > { %v4309_v35 = vadd.f32 %v2910_v33, %v2623_v16  ;;  %v1950_v37 = vpop.f32.mrb[11].mxu1  ;;  %1998 = vadd.xlane.f32.xlu0 %v4307_v30 }
 0x443   : > { %v4315_v42 = vadd.f32 %v2623_v16, %v1950_v37 }
 0x444   : > { %2000 = vadd.xlane.f32.xlu1 %v4309_v35 }
 0x446   : > { %1994 = vadd.xlane.f32.xlu0 %v4312_v39 }
 0x447   : > { %v2913_v43 = vpop.f32.mrb[12].mxu1 }
 0x448   : > { %1996 = vadd.xlane.f32.xlu1 %v4315_v42  ;;  %v1963_v45 = vpop.f32.mrb[13].mxu1  ;;  %v4324_v48 = vadd.f32 %v2913_v43, %v2623_v16 }
 0x449   : > { %v4319_v47 = vadd.f32 %v2623_v16, %v1963_v45  ;;  %v2914_v36 = vpop.f32.mrb[14].mxu1 }
 0x44a   : > { %v1966_v41 = vpop.f32.mrb[15].mxu1  ;;  %v4327_v44 = vadd.f32 %v2914_v36, %v2623_v16 }
 0x44b   : > { %v4321_v38 = vadd.f32 %v2623_v16, %v1966_v41  ;;  %2002 = vadd.xlane.f32.xlu0 %v4319_v47 }
 0x44d   : > { %2004 = vadd.xlane.f32.xlu1 %v4321_v38 }
 0x44f   : > { %2006 = vadd.xlane.f32.xlu0 %v4324_v48 }
 0x451   : > { %2008 = vadd.xlane.f32.xlu1 %v4327_v44 }
 0x4be   : > { %v1983_v49 = vpop.xlane.xlu1 %1982 }
 0x4bf   : > { %v2013_v50 = vmul.f32 0.0078125, %v1983_v49  ;;  %v1979_v51 = vpop.xlane.xlu0 %1978 }
 0x4c0   : > { %v2011_v54 = vmul.f32 0.0078125, %v1979_v51 }
 0x4c1   : > { %v4331_v56 = vsub.f32 %v1924_v17, %v2013_v50 }
 0x4c2   : > { %v1985_v61 = vpop.xlane.xlu1 %1984  ;;  %v4333_v62 = vsub.f32 %v1916_v19, %v2011_v54 }
 0x4c3   : > { %v2014_v22 = vmul.f32 0.0078125, %v1985_v61  ;;  %v1981_v4 = vpop.xlane.xlu0 %1980  ;;  %v2045_v9 = vmul.f32 %v4331_v56, %v4331_v56 }
 0x4c4   : > { %v2012_v10 = vmul.f32 0.0078125, %v1981_v4  ;;  %v2043_v16 = vmul.f32 %v4333_v62, %v4333_v62 }
 0x4c5   : > { %v4337_v55 = vsub.f32 %v1927_v40, %v2014_v22  ;;  %2063 = vadd.xlane.f32.xlu0 %v2045_v9 }
 0x4c6   : > { %v4339_v13 = vsub.f32 %v1919_v34, %v2012_v10 }
 0x4c7   : > { %v1991_v14 = vpop.xlane.xlu0 %1990  ;;  %v2046_v3 = vmul.f32 %v4337_v55, %v4337_v55 }
 0x4c8   : > { %v2017_v15 = vmul.f32 0.0078125, %v1991_v14  ;;  %v1993_v17 = vpop.xlane.xlu1 %1992  ;;  %v2044_v40 = vmul.f32 %v4339_v13, %v4339_v13 }
 0x4c9   : > { %v2018_v18 = vmul.f32 0.0078125, %v1993_v17  ;;  %2065 = vadd.xlane.f32.xlu1 %v2046_v3  ;;  %2059 = vadd.xlane.f32.xlu0 %v2043_v16 }
 0x4ca   : > { %v4345_v19 = vsub.f32 %v1940_v29, %v2017_v15 }
 0x4cb   : > { %v4347_v24 = vsub.f32 %v1943_v32, %v2018_v18  ;;  %v1987_v28 = vpop.xlane.xlu0 %1986 }
 0x4cc   : > { %v2015_v34 = vmul.f32 0.0078125, %v1987_v28  ;;  %v1989_v46 = vpop.xlane.xlu1 %1988  ;;  %v2049_v20 = vmul.f32 %v4345_v19, %v4345_v19 }
 0x4cd   : > { %v2016_v26 = vmul.f32 0.0078125, %v1989_v46  ;;  %2061 = vadd.xlane.f32.xlu1 %v2044_v40  ;;  %v2050_v32 = vmul.f32 %v4347_v24, %v4347_v24 }
 0x4ce   : > { %v4353_v21 = vsub.f32 %v1932_v23, %v2015_v34  ;;  %2071 = vadd.xlane.f32.xlu0 %v2049_v20 }
 0x4cf   : > { %v4355_v27 = vsub.f32 %v1935_v25, %v2016_v26  ;;  %v1999_v29 = vpop.xlane.xlu0 %1998 }
 0x4d0   : > { %v2021_v31 = vmul.f32 0.0078125, %v1999_v29  ;;  %v2047_v33 = vmul.f32 %v4353_v21, %v4353_v21 }
 0x4d1   : > { %v2001_v37 = vpop.xlane.xlu1 %2000  ;;  %2073 = vadd.xlane.f32.xlu1 %v2050_v32  ;;  %v2048_v25 = vmul.f32 %v4355_v27, %v4355_v27 }
 0x4d2   : > { %v4362_v43 = vsub.f32 %v4307_v30, %v2021_v31  ;;  %v2022_v45 = vmul.f32 0.0078125, %v2001_v37  ;;  %2067 = vadd.xlane.f32.xlu0 %v2047_v33 }
 0x4d3   : > { %v1995_v23 = vpop.xlane.xlu0 %1994 }
 0x4d4   : > { %v4367_v36 = vsub.f32 %v4309_v35, %v2022_v45  ;;  %v2019_v41 = vmul.f32 0.0078125, %v1995_v23  ;;  %v2053_v49 = vmul.f32 %v4362_v43, %v4362_v43 }
 0x4d5   : > { %v1997_v50 = vpop.xlane.xlu1 %1996  ;;  %2069 = vadd.xlane.f32.xlu1 %v2048_v25 }
 0x4d6   : > { %v4372_v51 = vsub.f32 %v4312_v39, %v2019_v41  ;;  %v2020_v30 = vmul.f32 0.0078125, %v1997_v50  ;;  %2079 = vadd.xlane.f32.xlu0 %v2053_v49  ;;  %v2054_v54 = vmul.f32 %v4367_v36, %v4367_v36 }
 0x4d8   : > { %v4377_v61 = vsub.f32 %v4315_v42, %v2020_v30  ;;  %v2003_v22 = vpop.xlane.xlu0 %2002  ;;  %v2051_v35 = vmul.f32 %v4372_v51, %v4372_v51 }
 0x4d9   : > { %v2023_v4 = vmul.f32 0.0078125, %v2003_v22  ;;  %2081 = vadd.xlane.f32.xlu1 %v2054_v54 }
 0x4da   : > { %v2005_v9 = vpop.xlane.xlu1 %2004  ;;  %2075 = vadd.xlane.f32.xlu0 %v2051_v35  ;;  %v2052_v14 = vmul.f32 %v4377_v61, %v4377_v61 }
 0x4db   : > { %v4382_v10 = vsub.f32 %v4319_v47, %v2023_v4  ;;  %v2024_v39 = vmul.f32 0.0078125, %v2005_v9  ;;  %v4406_v4 = vld [vmem:[%s4653_s12] ss:$0 sm:$0xff] }
 0x4dc   : > { %v2007_v3 = vpop.xlane.xlu0 %2006 }
 0x4dd   : > { %v4387_v16 = vsub.f32 %v4321_v38, %v2024_v39  ;;  %v2025_v42 = vmul.f32 0.0078125, %v2007_v3  ;;  %2077 = vadd.xlane.f32.xlu1 %v2052_v14  ;;  %v2055_v15 = vmul.f32 %v4382_v10, %v4382_v10 }
 0x4de   : > { %v2009_v17 = vpop.xlane.xlu1 %2008 }
 0x4df   : > { %v4392_v18 = vsub.f32 %v4324_v48, %v2025_v42  ;;  %v2026_v28 = vmul.f32 0.0078125, %v2009_v17  ;;  %2083 = vadd.xlane.f32.xlu0 %v2055_v15  ;;  %v2056_v47 = vmul.f32 %v4387_v16, %v4387_v16  ;;  %v4412_v42 = vld [vmem:[%s4654_s0] ss:$0 sm:$0xff] }
 0x4e1   : > { %v4397_v40 = vsub.f32 %v4327_v44, %v2026_v28  ;;  %2085 = vadd.xlane.f32.xlu1 %v2056_v47  ;;  %v2057_v38 = vmul.f32 %v4392_v18, %v4392_v18 }
 0x4e3   : > { %2087 = vadd.xlane.f32.xlu0 %v2057_v38  ;;  %v2058_v34 = vmul.f32 %v4397_v40, %v4397_v40 }
 0x4e5   : > { %2089 = vadd.xlane.f32.xlu1 %v2058_v34 }
 0x552   : > { %v2064_v46 = vpop.xlane.xlu0 %2063 }
 0x553   : > { %v2093_v48 = vmul.f32 0.0078125, %v2064_v46 }
 0x555   : > { %v2109_v20 = vadd.f32 1e-05, %v2093_v48 }
 0x556   : > { %v2066_v26 = vpop.xlane.xlu1 %2065  ;;  %v2060_v29 = vpop.xlane.xlu0 %2059 }
 0x557   : > { %3202 = vrsqrt.f32 %v2109_v20  ;;  %v2094_v32 = vmul.f32 0.0078125, %v2066_v26  ;;  %v2091_v31 = vmul.f32 0.0078125, %v2060_v29 }
 0x559   : > { %v2110_v33 = vadd.f32 1e-05, %v2094_v32  ;;  %v2107_v44 = vadd.f32 1e-05, %v2091_v31 }
 0x55a   : > { %v2062_v37 = vpop.xlane.xlu1 %2061 }
 0x55b   : > { %3204 = vrsqrt.f32 %v2110_v33  ;;  %v2092_v45 = vmul.f32 0.0078125, %v2062_v37  ;;  %v2072_v23 = vpop.xlane.xlu0 %2071 }
 0x55c   : > { %3206 = vrsqrt.f32 %v2107_v44  ;;  %v2097_v25 = vmul.f32 0.0078125, %v2072_v23 }
 0x55d   : > { %v2108_v41 = vadd.f32 1e-05, %v2092_v45 }
 0x55e   : > { %v2113_v49 = vadd.f32 1e-05, %v2097_v25  ;;  %v2074_v50 = vpop.xlane.xlu1 %2073 }
 0x55f   : > { %3208 = vrsqrt.f32 %v2108_v41  ;;  %v2098_v30 = vmul.f32 0.0078125, %v2074_v50  ;;  %v2068_v54 = vpop.xlane.xlu0 %2067 }
 0x560   : > { %3210 = vrsqrt.f32 %v2113_v49  ;;  %v2095_v22 = vmul.f32 0.0078125, %v2068_v54 }
 0x561   : > { %v3203_v35 = vpop.eup %3202  ;;  %v2114_v9 = vadd.f32 1e-05, %v2098_v30 }
 0x562   : > { %v2141_v39 = vmul.f32 %v3203_v35, %v4331_v56  ;;  %v2111_v14 = vadd.f32 1e-05, %v2095_v22  ;;  %v2070_v3 = vpop.xlane.xlu1 %2069 }
 0x563   : > { %3212 = vrsqrt.f32 %v2114_v9  ;;  %v2096_v15 = vmul.f32 0.0078125, %v2070_v3  ;;  %v2080_v17 = vpop.xlane.xlu0 %2079 }
 0x564   : > { %v2164_v28 = vmul.f32 %v4406_v4, %v2141_v39  ;;  %3214 = vrsqrt.f32 %v2111_v14  ;;  %v2101_v47 = vmul.f32 0.0078125, %v2080_v17 }
 0x565   : > { %v3205_v38 = vpop.eup %3204  ;;  %v2112_v34 = vadd.f32 1e-05, %v2096_v15 }
 0x566   : > { %v3207_v46 = vpop.eup %3206  ;;  %v2187_v48 = vadd.f32 %v4412_v42, %v2164_v28  ;;  %v2142_v56 = vmul.f32 %v3205_v38, %v4337_v55  ;;  %v2117_v20 = vadd.f32 1e-05, %v2101_v47  ;;  %v2082_v26 = vpop.xlane.xlu1 %2081 }
 0x567   : > { %v2139_v29 = vmul.f32 %v3207_v46, %v4333_v62  ;;  %3216 = vrsqrt.f32 %v2112_v34  ;;  %v2102_v32 = vmul.f32 0.0078125, %v2082_v26  ;;  %v2076_v31 = vpop.xlane.xlu0 %2075 }
 0x568   : > { %v2203_v33 = vadd.f32 %v2187_v48, %v4164_v57  ;;  %v2165_v44 = vmul.f32 %v4406_v4, %v2142_v56  ;;  %3218 = vrsqrt.f32 %v2117_v20  ;;  %v2099_v37 = vmul.f32 0.0078125, %v2076_v31 }
 0x569   : > { %v3209_v45 = vpop.eup %3208  ;;  %v2162_v23 = vmul.f32 %v4406_v4, %v2139_v29  ;;  %v2118_v25 = vadd.f32 1e-05, %v2102_v32 }
 0x56a   : > { %v3211_v41 = vpop.eup %3210  ;;  %2219 = vst [vmem:[%s3988_s4 + $0x10] sm:$0xff] %v2203_v33  ;;  %v2188_v55 = vadd.f32 %v4412_v42, %v2165_v44  ;;  %v2140_v49 = vmul.f32 %v3209_v45, %v4339_v13  ;;  %v2115_v62 = vadd.f32 1e-05, %v2099_v37  ;;  %v2078_v50 = vpop.xlane.xlu1 %2077 }
 0x56b   : > { %v2185_v30 = vadd.f32 %v4412_v42, %v2162_v23  ;;  %v2145_v57 = vmul.f32 %v3211_v41, %v4345_v19  ;;  %3220 = vrsqrt.f32 %v2118_v25  ;;  %v2100_v54 = vmul.f32 0.0078125, %v2078_v50 }
 0x56c   : > { %v2204_v22 = vadd.f32 %v2188_v55, %v4167_v58  ;;  %v2163_v35 = vmul.f32 %v4406_v4, %v2140_v49  ;;  %3222 = vrsqrt.f32 %v2115_v62  ;;  %v2084_v9 = vpop.xlane.xlu0 %2083 }
 0x56d   : > { %v3213_v39 = vpop.eup %3212  ;;  %v2201_v14 = vadd.f32 %v2185_v30, %v4156_v52  ;;  %v2168_v13 = vmul.f32 %v4406_v4, %v2145_v57  ;;  %v2116_v3 = vadd.f32 1e-05, %v2100_v54  ;;  %v2103_v15 = vmul.f32 0.0078125, %v2084_v9 }
 0x56e   : > { %v3215_v17 = vpop.eup %3214  ;;  %2220 = vst [vmem:[%s3988_s4 + $0x18] sm:$0xff] %v2204_v22  ;;  %v2186_v19 = vadd.f32 %v4412_v42, %v2163_v35  ;;  %v2146_v28 = vmul.f32 %v3213_v39, %v4347_v24  ;;  %v2086_v47 = vpop.xlane.xlu1 %2085 }
 0x56f   : > { %2217 = vst [vmem:[%s3988_s4] sm:$0xff] %v2201_v14  ;;  %v2191_v58 = vadd.f32 %v4412_v42, %v2168_v13  ;;  %v2143_v38 = vmul.f32 %v3215_v17, %v4353_v21  ;;  %3224 = vrsqrt.f32 %v2116_v3  ;;  %v2119_v34 = vadd.f32 1e-05, %v2103_v15 }
 0x570   : > { %v2202_v52 = vadd.f32 %v2186_v19, %v4159_v53  ;;  %v2169_v46 = vmul.f32 %v4406_v4, %v2146_v28  ;;  %v2104_v48 = vmul.f32 0.0078125, %v2086_v47  ;;  %v2088_v56 = vpop.xlane.xlu0 %2087 }
 0x571   : > { %v3217_v20 = vpop.eup %3216  ;;  %v2207_v26 = vadd.f32 %v2191_v58, %v4180_v63  ;;  %v2166_v24 = vmul.f32 %v4406_v4, %v2143_v38  ;;  %3226 = vrsqrt.f32 %v2119_v34  ;;  %v2105_v29 = vmul.f32 0.0078125, %v2088_v56 }
 0x572   : > { %v3219_v32 = vpop.eup %3218  ;;  %2218 = vst [vmem:[%s3988_s4 + $0x8] sm:$0xff] %v2202_v52  ;;  %v2192_v21 = vadd.f32 %v4412_v42, %v2169_v46  ;;  %v2144_v31 = vmul.f32 %v3217_v20, %v4355_v27  ;;  %v2120_v33 = vadd.f32 1e-05, %v2104_v48  ;;  %v2090_v53 = vpop.xlane.xlu1 %2089 }
 0x573   : > { %2223 = vst [vmem:[%s3988_s4 + $0x30] sm:$0xff] %v2207_v26  ;;  %v2189_v44 = vadd.f32 %v4412_v42, %v2166_v24  ;;  %v2149_v37 = vmul.f32 %v3219_v32, %v4362_v43  ;;  %v2121_v63 = vadd.f32 1e-05, %v2105_v29  ;;  %v2106_v45 = vmul.f32 0.0078125, %v2090_v53 }
 0x574   : > { %v2208_v23 = vadd.f32 %v2192_v21, %v4183_v0  ;;  %v2167_v25 = vmul.f32 %v4406_v4, %v2144_v31  ;;  %3228 = vrsqrt.f32 %v2120_v33 }
 0x575   : > { %v3221_v41 = vpop.eup %3220  ;;  %v2205_v55 = vadd.f32 %v2189_v44, %v4170_v59  ;;  %v2172_v27 = vmul.f32 %v4406_v4, %v2149_v37  ;;  %3230 = vrsqrt.f32 %v2121_v63  ;;  %v2122_v49 = vadd.f32 1e-05, %v2106_v45 }
 0x576   : > { %v3223_v62 = vpop.eup %3222  ;;  %2224 = vst [vmem:[%s3988_s4 + $0x38] sm:$0xff] %v2208_v23  ;;  %v2190_v43 = vadd.f32 %v4412_v42, %v2167_v25  ;;  %v2150_v50 = vmul.f32 %v3221_v41, %v4367_v36 }
 0x577   : > { %2221 = vst [vmem:[%s3988_s4 + $0x20] sm:$0xff] %v2205_v55  ;;  %v2195_v0 = vadd.f32 %v4412_v42, %v2172_v27  ;;  %v2147_v30 = vmul.f32 %v3223_v62, %v4372_v51  ;;  %3232 = vrsqrt.f32 %v2122_v49 }
 0x578   : > { %v2206_v59 = vadd.f32 %v2190_v43, %v4173_v60  ;;  %v2173_v57 = vmul.f32 %v4406_v4, %v2150_v50 }
 0x579   : > { %v3225_v54 = vpop.eup %3224  ;;  %v2211_v22 = vadd.f32 %v2195_v0, %v4196_v5  ;;  %v2170_v35 = vmul.f32 %v4406_v4, %v2147_v30 }
 0x57a   : > { %2222 = vst [vmem:[%s3988_s4 + $0x28] sm:$0xff] %v2206_v59  ;;  %v2196_v36 = vadd.f32 %v4412_v42, %v2173_v57  ;;  %v2148_v9 = vmul.f32 %v3225_v54, %v4377_v61 }
 0x57b   : > { %v3227_v39 = vpop.eup %3226  ;;  %2227 = vst [vmem:[%s3988_s4 + $0x50] sm:$0xff] %v2211_v22  ;;  %v2193_v51 = vadd.f32 %v4412_v42, %v2170_v35 }
 0x57c   : > { %v2212_v60 = vadd.f32 %v2196_v36, %v4199_v6  ;;  %v2171_v14 = vmul.f32 %v4406_v4, %v2148_v9  ;;  %v2151_v13 = vmul.f32 %v3227_v39, %v4382_v10 }
 0x57d   : > { %v2209_v5 = vadd.f32 %v2193_v51, %v4186_v1 }
 0x57e   : > { %v3229_v3 = vpop.eup %3228  ;;  %2228 = vst [vmem:[%s3988_s4 + $0x58] sm:$0xff] %v2212_v60  ;;  %v2194_v15 = vadd.f32 %v4412_v42, %v2171_v14  ;;  %v2174_v61 = vmul.f32 %v4406_v4, %v2151_v13 }
 0x57f   : > { %v3231_v17 = vpop.eup %3230  ;;  %2225 = vst [vmem:[%s3988_s4 + $0x40] sm:$0xff] %v2209_v5  ;;  %v2152_v19 = vmul.f32 %v3229_v3, %v4387_v16 }
 0x580   : > { %v2210_v6 = vadd.f32 %v2194_v15, %v4189_v2  ;;  %v2197_v28 = vadd.f32 %v4412_v42, %v2174_v61  ;;  %v2153_v10 = vmul.f32 %v3231_v17, %v4392_v18 }
 0x581   : > { %v3233_v1 = vpop.eup %3232  ;;  %v2175_v47 = vmul.f32 %v4406_v4, %v2152_v19 }
 0x582   : > { %2226 = vst [vmem:[%s3988_s4 + $0x48] sm:$0xff] %v2210_v6  ;;  %v2213_v58 = vadd.f32 %v2197_v28, %v4202_v7  ;;  %v2176_v38 = vmul.f32 %v4406_v4, %v2153_v10  ;;  %v2154_v34 = vmul.f32 %v3233_v1, %v4397_v40 }
 0x583   : > { %v2198_v16 = vadd.f32 %v4412_v42, %v2175_v47 }
 0x584   : > { %2229 = vst [vmem:[%s3988_s4 + $0x60] sm:$0xff] %v2213_v58  ;;  %v2199_v2 = vadd.f32 %v4412_v42, %v2176_v38  ;;  %v2177_v52 = vmul.f32 %v4406_v4, %v2154_v34 }
 0x585   : > { %v2214_v18 = vadd.f32 %v2198_v16, %v4205_v8 }
 0x586   : > { %v2215_v46 = vadd.f32 %v2199_v2, %v4212_v11  ;;  %v2200_v48 = vadd.f32 %v4412_v42, %v2177_v52 }
 0x587   : > { %2230 = vst [vmem:[%s3988_s4 + $0x68] sm:$0xff] %v2214_v18 }
 0x588   : > { %2231 = vst [vmem:[%s3988_s4 + $0x70] sm:$0xff] %v2215_v46  ;;  %v2216_v7 = vadd.f32 %v2200_v48, %v4215_v12 }
 0x58a   : > { %2232 = vst [vmem:[%s3988_s4 + $0x78] sm:$0xff] %v2216_v7 }
 0x58b PF: > { %s4655_s26 = sld [smem:[#allocation24_spill]]  ;;  %s4657_s24 = sld [smem:[#allocation28_spill]] }
 0x58c   : > { %s4658_s30 = sld [smem:[#allocation37_spill]]  ;;  %s2247_s7 = sshll.u32 %s3988_s4, 4  ;;  %s4500_s7 = int_to_ptr.vmem [resolvable:$true] %s2247_s7 }
 0x58d   : > { %s4504_s14 = scalar_lea.sflag [#allocation5], %s439_s3  ;;  %s3408_s29 = scalar_lea.vmem %s4500_s7, 2048 }
 0x58e   : > { %p3409_p11 = scmp.ne.s32.totalorder %s4500_s7, %s3408_s29  ;;  %s3560_s10 = smov [#allocation14]  }
 0x58f   : > { %s3412_s27 = sshll.u32 %s3560_s10, 4  ;;  %s3413_s27 = int_to_ptr.vmem [resolvable:$false] %s3412_s27 }
 0x590   : > { %s3414_s12 = scalar_lea.vmem %s3413_s27, 4096  ;;  %p3415_p8 = scmp.lt.s32.totalorder %s4500_s7, %s3413_s27 }
 0x591   : > { %s2642_s1 = sshll.u32 %s4655_s26, 11  ;;  %p4659_p10 = scmp.ne.s32.totalorder %s4657_s24, 0 }
 0x592   : > { %s4497_s16 = scalar_lea.hbm %s4658_s30, %s2642_s1  ;;  %p3416_p1 = scmp.lt.s32.totalorder %s3414_s12, %s3408_s29 }
 0x593   : > { %p3410_p6 = pnand %p3409_p11, %p4659_p10 }
 0x594   : > { %p3417_p2 = por %p3416_p1, %p3415_p8 }
 0x595   : > { %p3411_p3 = pneg %p3410_p6 }
 0x597   : > { %p3418_p5 = pnand %p3417_p2, %p3411_p3 }
 0x599   : > { %3421 = shalt.err (!%p3418_p5)
}
 0x59a   : > { %s3422_s3 = scalar_lea.hbm %s4497_s16, 2048  ;;  %s3426_s28 = scalar_lea.hbm %s4658_s30, 4096 }
 0x59b   : > { %p3423_p13 = scmp.ne.s32.totalorder %s4497_s16, %s3422_s3  ;;  %p3427_p0 = scmp.lt.u32.totalorder %s4497_s16, %s4658_s30 }
 0x59c   : > { %p3428_p4 = scmp.lt.u32.totalorder %s3426_s28, %s3422_s3  ;;  %p3430_p11 = scmp.lt.u32.totalorder %s3422_s3, %s4497_s16 }
 0x59d   : > { %p3424_p9 = pnand %p3423_p13, %p4659_p10 }
 0x59e   : > { %p3429_p7 = por %p3428_p4, %p3427_p0 }
 0x59f   : > { %p3425_p12 = pneg %p3424_p9 }
 0x5a0   : > { %p3431_p6 = por %p3430_p11, %p3429_p7 }
 0x5a2   : > { %p3432_p3 = pnand %p3431_p6, %p3425_p12 }
 0x5a4   : > { %3435 = shalt.err (!%p3432_p3)
}
 0x5a5   : > { %s3561_s20 = smov 128   ;;  %s3562_s1 = smov 8  }
 0x5a6   : > { %2949 = dma.vmem_to_hbm [thread:$0]  (%p4659_p10), %s4500_s7, 2048, %s4497_s16, %s4504_s14, %s3561_s20, %s3561_s20, %s3562_s1  }
 0x5a7 PF: > { %s4660_s9 = sld [smem:[#allocation21_spill]]  ;;  %s4661_s19 = sld [smem:[#allocation26_spill]] }
 0x5a8   : > { %p2982_p8 = scmp.ge.s32.totalorder %s3546_s23, 2 }
 0x5ad   : > { %s2262_s29 = sand.u32 1, %s4660_s9   ;;  %p4662_p1 = scmp.ne.s32.totalorder %s4661_s19, 0 }
 0x5ae   : > { %s2263_s10 = scalar_lea.sflag [#allocation5], %s2262_s29 }
 0x5af   : > { %p2972_p2 = pnand %p2982_p8, %p4662_p1 }
 0x5b1   : > { %3501 = dma.done.wait (!%p2972_p2), %s2263_s10, 2048  }
 0x5b2   : > { %3503 = vsyncadd (!%p2972_p2), %s2263_s10, 4294965248  ;;  %s31_s23 = sadd.s32 1, %s3546_s23   ;;  %s4663_s27 = sld [smem:[#allocation22_spill]] }
 0x5b3   : > { %p28_p5 = scmp.ge.s32.totalorder %s31_s23, 6   ;;  %s4664_s24 = smov %s4680_s13 }
 0x5b4   : > { %s4666_s14 = smov %s3514_s15  ;;  %s4667_s15 = smov %s3872_s5 }
 0x5b5   : > { %s4668_s16 = smov %s3522_s17  ;;  %s4669_s17 = smov %s3526_s18 }
 0x5b6   : > { %s4670_s18 = smov %s3863_s8  ;;  %s4671_s19 = smov %s3538_s21 }
 0x5b7   : > { %s4672_s20 = smov %s3542_s22  ;;  %s4673_s21 = smov %s4676_s11 }
 0x5b8   : > { %s4665_s13 = smov %s4663_s27  ;;  %s4674_s22 = smov %s4664_s24 }
 0x5b9   :  { %30 = sbr.rel (!%p28_p5) target bundleno = 23 (0x17), region = 149 }
 0x5c0   :  { %2268 = vsyncpa [#allocation4], 1 }
 0x5c1   :  { %2270 = vsyncpa [#allocation4 + $0x1], 1 }
 0x5c2   :  { %2271 = vsyncpa [#allocation7], 1 }
 0x5c3   :  { %2273 = vsyncpa [#allocation7 + $0x1], 1 }
 0x5c4   :  { %2274 = vsyncpa [#allocation10], 1 }
 0x5c5   :  { %2275 = vsyncpa [#allocation13], 1 }
 0x5c6   :  { %2276 = vsyncpa [#allocation5], 1 }
 0x5c7   :  { %2278 = vsyncpa [#allocation5 + $0x1], 1 }

</bundles_post_ra>
